<compile_context>
chip_gen: v7x
topology: tpu7x:2x2x1
jax: 0.10.0
libtpu: 0.0.40
codegen_flags: <defaults>
</compile_context>

<pallas_src>
import jax
import jax.numpy as jnp
from jax.experimental import pallas as pl
from jax.experimental.pallas import tpu as pltpu


def _round_up(x, m):
    return ((x + m - 1) // m) * m


def _vmem_capacity_bytes():
    try:
        return int(pltpu.get_tpu_info().vmem_capacity_bytes)
    except Exception:
        return 64 << 20  # v7x per-TensorCore worst case


# ------------------------------ kernel --------------------------------------

def fusion_kernel(
    xr_ref, xd_ref,            # (TB, C) bf16 rgb / depth features
    war_ref, bar_ref,          # attention map rgb:   (C, C) wdt, (1, C) f32
    wad_ref, bad_ref,          # attention map depth: (C, C) wdt, (1, C) f32
    w1r_ref, w1d_ref, b1_ref,  # fc1 halves with BN folded in: (C, C), (C, C), (1, C)
    w2_ref, b2_ref,            # fc2: (C, NCLS_PAD) wdt, (1, NCLS_PAD) f32
    logits_ref, fused_ref,     # outputs: (TB, NCLS_PAD) f32, (TB, C) fused dtype
):
    xr = xr_ref[...]           # already bf16 -> fed straight to the MXU
    xd = xd_ref[...]
    wdt = war_ref.dtype        # matmul storage dtype (bf16 by default)

    # Attention maps: sigmoid(Linear(x)); matmuls in wdt, accumulate f32.
    att_r = jax.nn.sigmoid(
        jnp.dot(xr, war_ref[...], preferred_element_type=jnp.float32) + bar_ref[...]
    )
    att_d = jax.nn.sigmoid(
        jnp.dot(xd, wad_ref[...], preferred_element_type=jnp.float32) + bad_ref[...]
    )

    # Gating: bf16 * f32 promotes to f32; cast once for the fc1 MXU matmuls.
    xr_g = (att_r * xr).astype(wdt)
    xd_g = (att_d * xd).astype(wdt)

    # fc1 on concat([xr_g, xd_g], axis=1) == xr_g @ W1[:C] + xd_g @ W1[C:].
    # BatchNorm1d (eval) scale/shift is already folded into w1*/b1.
    h = (
        jnp.dot(xr_g, w1r_ref[...], preferred_element_type=jnp.float32)
        + jnp.dot(xd_g, w1d_ref[...], preferred_element_type=jnp.float32)
        + b1_ref[...]
    )
    h = jnp.maximum(h, 0.0)    # ReLU

    fused_ref[...] = h.astype(fused_ref.dtype)
    logits_ref[...] = (
        jnp.dot(h.astype(wdt), w2_ref[...], preferred_element_type=jnp.float32)
        + b2_ref[...]
    )


# ------------------------------ params --------------------------------------

def prepare_params(p, *, weight_dtype=jnp.bfloat16, lane=128, eps=1e-5):
    """Fold BN (eval mode) into fc1, pad num_classes to a 128-lane multiple,
    cast matmul weights to `weight_dtype` (biases stay f32)."""
    C = p["w_ar"].shape[0]
    s = p["gamma"] / jnp.sqrt(p["run_var"] + eps)            # (C,)
    t = p["beta"] - p["run_mean"] * s                        # (C,)
    w1 = p["w1"] * s[None, :]                                # scale per output col
    b1 = p["b1"].reshape(1, C) * s[None, :] + t[None, :]     # (1, C)

    ncls = p["w2"].shape[1]
    ncls_pad = pl.cdiv(ncls, lane) * lane
    w2 = jnp.pad(p["w2"], ((0, 0), (0, ncls_pad - ncls)))
    b2 = jnp.pad(p["b2"].reshape(1, ncls), ((0, 0), (0, ncls_pad - ncls)))

    w = lambda a: a.astype(weight_dtype)
    f = lambda a: a.astype(jnp.float32)
    return {
        "w_ar": w(p["w_ar"]), "b_ar": f(p["b_ar"].reshape(1, C)),
        "w_ad": w(p["w_ad"]), "b_ad": f(p["b_ad"].reshape(1, C)),
        "w1_rgb": w(w1[:C]), "w1_depth": w(w1[C:]), "b1": f(b1),
        "w2": w(w2), "b2": f(b2),
    }


# ------------------------------ wrapper -------------------------------------

def attention_fusion_1d(x_rgb, x_depth, kparams, *, num_classes, tb=None,
                        single_buffer_weights=True,
                        in_dtype=jnp.bfloat16, fused_dtype=jnp.bfloat16):
    B, C = x_rgb.shape
    ncls_pad = kparams["w2"].shape[1]
    wbytes = jnp.dtype(kparams["w_ar"].dtype).itemsize

    # Batch-tile selection:
    #   * small batch -> round_up(B, 16): no zero-row DMA / wasted MXU rows,
    #     16-row granularity keeps bf16 sublane packing native;
    #   * large batch -> 256-row tiles fill the 256x256 MXU M dim (v6e/v7x)
    #     and halve the number of grid steps.
    if tb is None:
        tb = 256 if B >= 512 else min(128, _round_up(max(B, 1), 16))

    b_pad = _round_up(B, tb)
    if b_pad != B:
        x_rgb = jnp.pad(x_rgb, ((0, b_pad - B), (0, 0)))
        x_depth = jnp.pad(x_depth, ((0, b_pad - B), (0, 0)))
    # DMA the features as bf16 (halves input HBM traffic + input VMEM).
    x_rgb = x_rgb.astype(in_dtype)
    x_depth = x_depth.astype(in_dtype)
    grid_steps = b_pad // tb

    feat_spec = pl.BlockSpec((tb, C), lambda i: (i, 0))

    def const_spec(shape):
        # Grid-invariant operand (constant index_map). Request a single VMEM
        # buffer: default double-buffering would hold 2 copies of every weight
        # (~2x resident footprint at the real C=1280).
        if single_buffer_weights:
            return pl.BlockSpec(shape, lambda i: (0, 0),
                                pipeline_mode=pl.Buffered(1))
        return pl.BlockSpec(shape, lambda i: (0, 0))

    # Scoped-VMEM budget from the actual footprint, capped by the chip's
    # physical VMEM (generation-aware: 64 MiB/TC on v7x, 128 MiB on v5e/v6e).
    nbuf = 1 if single_buffer_weights else 2
    in_b = jnp.dtype(in_dtype).itemsize
    fu_b = jnp.dtype(fused_dtype).itemsize
    weight_bytes = nbuf * ((4 * C * C + C * ncls_pad) * wbytes
                           + (3 * C + ncls_pad) * 8 * 4)      # (1,C) rows pad to 8 sublanes
    act_bytes = 2 * 2 * tb * C * in_b                          # inputs, double-buffered
    out_bytes = 2 * (tb * C * fu_b + tb * ncls_pad * 4)        # outputs, double-buffered
    scratch_bytes = 6 * tb * max(C, ncls_pad) * 4              # f32 intermediates (att, gated, h)
    cap = _vmem_capacity_bytes()
    vmem_limit = int(weight_bytes + act_bytes + out_bytes + scratch_bytes) + (8 << 20)
    vmem_limit = max(min(vmem_limit, int(0.85 * cap)), 16 << 20)

    # Megacore policy: only shard batch tiles across TensorCores when every
    # core gets >= 2 tiles; otherwise the duplicated per-core weight DMA
    # outweighs any compute win (this kernel is weight-DMA-bound at small B).
    dims = ("parallel",) if grid_steps >= 4 else ("arbitrary",)

    grid_spec = pltpu.PrefetchScalarGridSpec(
        num_scalar_prefetch=0,
        grid=(grid_steps,),
        in_specs=[
            feat_spec,                          # x_rgb
            feat_spec,                          # x_depth
            const_spec((C, C)), const_spec((1, C)),             # w_ar, b_ar
            const_spec((C, C)), const_spec((1, C)),             # w_ad, b_ad
            const_spec((C, C)), const_spec((C, C)),             # w1_rgb, w1_depth
            const_spec((1, C)),                                 # b1 (BN folded)
            const_spec((C, ncls_pad)), const_spec((1, ncls_pad)),  # w2, b2
        ],
        out_specs=[
            pl.BlockSpec((tb, ncls_pad), lambda i: (i, 0)),     # logits (padded lanes)
            pl.BlockSpec((tb, C), lambda i: (i, 0)),            # X_fused ('late')
        ],
    )

    logits_p, fused_p = pl.pallas_call(
        fusion_kernel,
        out_shape=(
            jax.ShapeDtypeStruct((b_pad, ncls_pad), jnp.float32),
            jax.ShapeDtypeStruct((b_pad, C), fused_dtype),
        ),
        grid_spec=grid_spec,
        compiler_params=pltpu.CompilerParams(
            dimension_semantics=dims,
            vmem_limit_bytes=vmem_limit,
        ),
    )(
        x_rgb, x_depth,
        kparams["w_ar"], kparams["b_ar"],
        kparams["w_ad"], kparams["b_ad"],
        kparams["w1_rgb"], kparams["w1_depth"], kparams["b1"],
        kparams["w2"], kparams["b2"],
    )
    return logits_p[:B, :num_classes], {"late": fused_p[:B, :]}


# ----------------------------- references ----------------------------------

def reference_raw(x_rgb, x_depth, p, eps=1e-5):
    """Pure-f32 reference mirroring the PyTorch forward (BN in eval mode)."""
    att_r = jax.nn.sigmoid(x_rgb @ p["w_ar"] + p["b_ar"])
    att_d = jax.nn.sigmoid(x_depth @ p["w_ad"] + p["b_ad"])
    xf = jnp.concatenate([att_r * x_rgb, att_d * x_depth], axis=1)
    y = xf @ p["w1"] + p["b1"]
    y = (y - p["run_mean"]) * (p["gamma"] / jnp.sqrt(p["run_var"] + eps)) + p["beta"]
    h = jnp.maximum(y, 0.0)
    return h @ p["w2"] + p["b2"], h


def reference_folded(x_rgb, x_depth, fp, num_classes, in_dtype=jnp.bfloat16):
    """Quantization-aware reference: same folded params and the same
    low-precision rounding of matmul operands/inputs as the kernel."""
    wdt = fp["w_ar"].dtype
    f32 = lambda a: a.astype(jnp.float32)
    q = lambda a: a.astype(wdt).astype(jnp.float32)
    xr = x_rgb.astype(in_dtype).astype(jnp.float32)
    xd = x_depth.astype(in_dtype).astype(jnp.float32)
    att_r = jax.nn.sigmoid(xr @ f32(fp["w_ar"]) + fp["b_ar"])
    att_d = jax.nn.sigmoid(xd @ f32(fp["w_ad"]) + fp["b_ad"])
    h = (q(att_r * xr) @ f32(fp["w1_rgb"])
         + q(att_d * xd) @ f32(fp["w1_depth"]) + fp["b1"])
    h = jnp.maximum(h, 0.0)
    logits = q(h) @ f32(fp["w2"]) + fp["b2"]
    return logits[:, :num_classes], h


def make_raw_params(key, C, num_classes):
    ks = jax.random.split(key, 10)
    scale = 1.0 / jnp.sqrt(C)
    return {
        "w_ar": scale * jax.random.normal(ks[0], (C, C), jnp.float32),
        "b_ar": 0.01 * jax.random.normal(ks[1], (1, C), jnp.float32),
        "w_ad": scale * jax.random.normal(ks[2], (C, C), jnp.float32),
        "b_ad": 0.01 * jax.random.normal(ks[3], (1, C), jnp.float32),
        "w1": scale * jax.random.normal(ks[4], (2 * C, C), jnp.float32),
        "b1": 0.01 * jnp.ones((1, C), jnp.float32),
        "w2": scale * jax.random.normal(ks[5], (C, num_classes), jnp.float32),
        "b2": jnp.zeros((1, num_classes), jnp.float32),
        "gamma": 1.0 + 0.1 * jax.random.normal(ks[6], (C,), jnp.float32),
        "beta": 0.1 * jax.random.normal(ks[7], (C,), jnp.float32),
        "run_mean": 0.05 * jax.random.normal(ks[8], (C,), jnp.float32),
        "run_var": 1.0 + 0.1 * jax.random.uniform(ks[9], (C,), jnp.float32),
    }


if __name__ == "__main__":
    B = 8              # batch (small demo shape)
    C = 128            # feature channels (1280 for efficientnet_b0 in the real model)
    NUM_CLASSES = 8

    key = jax.random.PRNGKey(0)
    k_rgb, k_depth, k_params = jax.random.split(key, 3)
    x_rgb = jax.random.normal(k_rgb, (B, C), jnp.float32)
    x_depth = jax.random.normal(k_depth, (B, C), jnp.float32)

    raw = make_raw_params(k_params, C, NUM_CLASSES)
    kparams = prepare_params(raw, weight_dtype=jnp.bfloat16)

    try:
        logits, feats = attention_fusion_1d(
            x_rgb, x_depth, kparams, num_classes=NUM_CLASSES,
            single_buffer_weights=True)
        jax.block_until_ready((logits, feats["late"]))
    except Exception:
        # pipeline_mode=pl.Buffered(1) unsupported on this jax version: fall
        # back to default double-buffering (identical numerics, ~2x weight VMEM).
        logits, feats = attention_fusion_1d(
            x_rgb, x_depth, kparams, num_classes=NUM_CLASSES,
            single_buffer_weights=False)
        jax.block_until_ready((logits, feats["late"]))

    assert logits.shape == (B, NUM_CLASSES)
    assert feats["late"].shape == (B, C)
    fused_f32 = feats["late"].astype(jnp.float32)

    # Tight check: identical folded params + same bf16 operand/input rounding.
    ref_logits_q, ref_fused_q = reference_folded(x_rgb, x_depth, kparams, NUM_CLASSES)
    assert jnp.allclose(logits, ref_logits_q, atol=2e-2, rtol=2e-2)
    assert jnp.allclose(fused_f32, ref_fused_q, atol=5e-2, rtol=5e-2)  # bf16 output ULP

    # Semantic check vs the pure-f32 PyTorch-style forward (loose: bf16 weights/IO).
    ref_logits, ref_fused = reference_raw(x_rgb, x_depth, raw)
    assert jnp.allclose(logits, ref_logits, atol=1e-1, rtol=1e-1)
    assert jnp.allclose(fused_f32, ref_fused, atol=1e-1, rtol=1e-1)

    print("KERNEL_OK")
</pallas_src>

<mosaic_0001>
module attributes {stable_mosaic.version = 11 : i64} {
  func.func @fusion_kernel(%arg0: i32, %arg1: memref<16x128xbf16, #tpu.memory_space<vmem>>, %arg2: memref<16x128xbf16, #tpu.memory_space<vmem>>, %arg3: memref<128x128xbf16, #tpu.memory_space<vmem>>, %arg4: memref<1x128xf32, #tpu.memory_space<vmem>>, %arg5: memref<128x128xbf16, #tpu.memory_space<vmem>>, %arg6: memref<1x128xf32, #tpu.memory_space<vmem>>, %arg7: memref<128x128xbf16, #tpu.memory_space<vmem>>, %arg8: memref<128x128xbf16, #tpu.memory_space<vmem>>, %arg9: memref<1x128xf32, #tpu.memory_space<vmem>>, %arg10: memref<128x128xbf16, #tpu.memory_space<vmem>>, %arg11: memref<1x128xf32, #tpu.memory_space<vmem>>, %arg12: memref<16x128xf32, #tpu.memory_space<vmem>>, %arg13: memref<16x128xbf16, #tpu.memory_space<vmem>>) attributes {dimension_semantics = [#tpu.dimension_semantics<arbitrary>], iteration_bounds = array<i64: 1>, scalar_prefetch = 0 : i64, scratch_operands = 0 : i64, tpu.core_type = #tpu.core_type<tc>, window_params = [{transform_indices = @transform_0, window_bounds = array<i64: 16, 128>}, {transform_indices = @transform_1, window_bounds = array<i64: 16, 128>}, {pipeline_mode = #tpu.pipeline_mode<synchronous>, transform_indices = @transform_2, window_bounds = array<i64: 128, 128>}, {pipeline_mode = #tpu.pipeline_mode<synchronous>, transform_indices = @transform_3, window_bounds = array<i64: 1, 128>}, {pipeline_mode = #tpu.pipeline_mode<synchronous>, transform_indices = @transform_4, window_bounds = array<i64: 128, 128>}, {pipeline_mode = #tpu.pipeline_mode<synchronous>, transform_indices = @transform_5, window_bounds = array<i64: 1, 128>}, {pipeline_mode = #tpu.pipeline_mode<synchronous>, transform_indices = @transform_6, window_bounds = array<i64: 128, 128>}, {pipeline_mode = #tpu.pipeline_mode<synchronous>, transform_indices = @transform_7, window_bounds = array<i64: 128, 128>}, {pipeline_mode = #tpu.pipeline_mode<synchronous>, transform_indices = @transform_8, window_bounds = array<i64: 1, 128>}, {pipeline_mode = #tpu.pipeline_mode<synchronous>, transform_indices = @transform_9, window_bounds = array<i64: 128, 128>}, {pipeline_mode = #tpu.pipeline_mode<synchronous>, transform_indices = @transform_10, window_bounds = array<i64: 1, 128>}, {transform_indices = @transform_11, window_bounds = array<i64: 16, 128>}, {transform_indices = @transform_12, window_bounds = array<i64: 16, 128>}]} {
    %c0 = arith.constant 0 : index
    %c0_0 = arith.constant 0 : index
    %0 = vector.load %arg1[%c0, %c0_0] : memref<16x128xbf16, #tpu.memory_space<vmem>>, vector<16x128xbf16>
    %c0_1 = arith.constant 0 : index
    %c0_2 = arith.constant 0 : index
    %1 = vector.load %arg2[%c0_1, %c0_2] : memref<16x128xbf16, #tpu.memory_space<vmem>>, vector<16x128xbf16>
    %c0_3 = arith.constant 0 : index
    %c0_4 = arith.constant 0 : index
    %2 = vector.load %arg3[%c0_3, %c0_4] : memref<128x128xbf16, #tpu.memory_space<vmem>>, vector<128x128xbf16>
    %cst = arith.constant dense<0.000000e+00> : vector<16x128xf32>
    %3 = tpu.matmul %0, %2, %cst {dimension_numbers = #tpu.dot_dimension_numbers<[1], [0], [0], [1], [0, 0, 1, 1], [], []>} : vector<16x128xbf16>, vector<128x128xbf16>, vector<16x128xf32> -> vector<16x128xf32>
    %c0_5 = arith.constant 0 : index
    %c0_6 = arith.constant 0 : index
    %4 = vector.load %arg4[%c0_5, %c0_6] : memref<1x128xf32, #tpu.memory_space<vmem>>, vector<1x128xf32>
    %5 = vector.broadcast %4 : vector<1x128xf32> to vector<16x128xf32>
    %6 = arith.addf %3, %5 : vector<16x128xf32>
    %7 = arith.negf %6 : vector<16x128xf32>
    %8 = math.exp %7 : vector<16x128xf32>
    %cst_7 = arith.constant 1.000000e+00 : f32
    %9 = vector.broadcast %cst_7 : f32 to vector<16x128xf32>
    %10 = arith.addf %9, %8 : vector<16x128xf32>
    %11 = arith.divf %9, %10 : vector<16x128xf32>
    %c0_8 = arith.constant 0 : index
    %c0_9 = arith.constant 0 : index
    %12 = vector.load %arg5[%c0_8, %c0_9] : memref<128x128xbf16, #tpu.memory_space<vmem>>, vector<128x128xbf16>
    %cst_10 = arith.constant dense<0.000000e+00> : vector<16x128xf32>
    %13 = tpu.matmul %1, %12, %cst_10 {dimension_numbers = #tpu.dot_dimension_numbers<[1], [0], [0], [1], [0, 0, 1, 1], [], []>} : vector<16x128xbf16>, vector<128x128xbf16>, vector<16x128xf32> -> vector<16x128xf32>
    %c0_11 = arith.constant 0 : index
    %c0_12 = arith.constant 0 : index
    %14 = vector.load %arg6[%c0_11, %c0_12] : memref<1x128xf32, #tpu.memory_space<vmem>>, vector<1x128xf32>
    %15 = vector.broadcast %14 : vector<1x128xf32> to vector<16x128xf32>
    %16 = arith.addf %13, %15 : vector<16x128xf32>
    %17 = arith.negf %16 : vector<16x128xf32>
    %18 = math.exp %17 : vector<16x128xf32>
    %cst_13 = arith.constant 1.000000e+00 : f32
    %19 = vector.broadcast %cst_13 : f32 to vector<16x128xf32>
    %20 = arith.addf %19, %18 : vector<16x128xf32>
    %21 = arith.divf %19, %20 : vector<16x128xf32>
    %22 = arith.extf %0 : vector<16x128xbf16> to vector<16x128xf32>
    %23 = arith.mulf %11, %22 : vector<16x128xf32>
    %24 = arith.truncf %23 : vector<16x128xf32> to vector<16x128xbf16>
    %25 = arith.extf %1 : vector<16x128xbf16> to vector<16x128xf32>
    %26 = arith.mulf %21, %25 : vector<16x128xf32>
    %27 = arith.truncf %26 : vector<16x128xf32> to vector<16x128xbf16>
    %c0_14 = arith.constant 0 : index
    %c0_15 = arith.constant 0 : index
    %28 = vector.load %arg7[%c0_14, %c0_15] : memref<128x128xbf16, #tpu.memory_space<vmem>>, vector<128x128xbf16>
    %cst_16 = arith.constant dense<0.000000e+00> : vector<16x128xf32>
    %29 = tpu.matmul %24, %28, %cst_16 {dimension_numbers = #tpu.dot_dimension_numbers<[1], [0], [0], [1], [0, 0, 1, 1], [], []>} : vector<16x128xbf16>, vector<128x128xbf16>, vector<16x128xf32> -> vector<16x128xf32>
    %c0_17 = arith.constant 0 : index
    %c0_18 = arith.constant 0 : index
    %30 = vector.load %arg8[%c0_17, %c0_18] : memref<128x128xbf16, #tpu.memory_space<vmem>>, vector<128x128xbf16>
    %cst_19 = arith.constant dense<0.000000e+00> : vector<16x128xf32>
    %31 = tpu.matmul %27, %30, %cst_19 {dimension_numbers = #tpu.dot_dimension_numbers<[1], [0], [0], [1], [0, 0, 1, 1], [], []>} : vector<16x128xbf16>, vector<128x128xbf16>, vector<16x128xf32> -> vector<16x128xf32>
    %32 = arith.addf %29, %31 : vector<16x128xf32>
    %c0_20 = arith.constant 0 : index
    %c0_21 = arith.constant 0 : index
    %33 = vector.load %arg9[%c0_20, %c0_21] : memref<1x128xf32, #tpu.memory_space<vmem>>, vector<1x128xf32>
    %34 = vector.broadcast %33 : vector<1x128xf32> to vector<16x128xf32>
    %35 = arith.addf %32, %34 : vector<16x128xf32>
    %cst_22 = arith.constant 0.000000e+00 : f32
    %36 = vector.broadcast %cst_22 : f32 to vector<16x128xf32>
    %37 = arith.maximumf %35, %36 : vector<16x128xf32>
    %38 = arith.truncf %37 : vector<16x128xf32> to vector<16x128xbf16>
    %c0_23 = arith.constant 0 : index
    %c0_24 = arith.constant 0 : index
    %39 = vector.load %arg13[%c0_23, %c0_24] : memref<16x128xbf16, #tpu.memory_space<vmem>>, vector<16x128xbf16>
    tpu.vector_store %arg13[%c0_23, %c0_24], %38 {strides = array<i32>} : memref<16x128xbf16, #tpu.memory_space<vmem>>, vector<16x128xbf16>,
    %40 = arith.truncf %37 : vector<16x128xf32> to vector<16x128xbf16>
    %c0_25 = arith.constant 0 : index
    %c0_26 = arith.constant 0 : index
    %41 = vector.load %arg10[%c0_25, %c0_26] : memref<128x128xbf16, #tpu.memory_space<vmem>>, vector<128x128xbf16>
    %cst_27 = arith.constant dense<0.000000e+00> : vector<16x128xf32>
    %42 = tpu.matmul %40, %41, %cst_27 {dimension_numbers = #tpu.dot_dimension_numbers<[1], [0], [0], [1], [0, 0, 1, 1], [], []>} : vector<16x128xbf16>, vector<128x128xbf16>, vector<16x128xf32> -> vector<16x128xf32>
    %c0_28 = arith.constant 0 : index
    %c0_29 = arith.constant 0 : index
    %43 = vector.load %arg11[%c0_28, %c0_29] : memref<1x128xf32, #tpu.memory_space<vmem>>, vector<1x128xf32>
    %44 = vector.broadcast %43 : vector<1x128xf32> to vector<16x128xf32>
    %45 = arith.addf %42, %44 : vector<16x128xf32>
    %c0_30 = arith.constant 0 : index
    %c0_31 = arith.constant 0 : index
    %46 = vector.load %arg12[%c0_30, %c0_31] : memref<16x128xf32, #tpu.memory_space<vmem>>, vector<16x128xf32>
    tpu.vector_store %arg12[%c0_30, %c0_31], %45 {strides = array<i32>} : memref<16x128xf32, #tpu.memory_space<vmem>>, vector<16x128xf32>,
    return
  }
  func.func @transform_0(%arg0: i32) -> (i32, i32) {
    %c0_i32 = arith.constant 0 : i32
    %c0_i32_0 = arith.constant 0 : i32
    return %arg0, %c0_i32 : i32, i32
  }
  func.func @transform_1(%arg0: i32) -> (i32, i32) {
    %c0_i32 = arith.constant 0 : i32
    %c0_i32_0 = arith.constant 0 : i32
    return %arg0, %c0_i32 : i32, i32
  }
  func.func @transform_2(%arg0: i32) -> (i32, i32) {
    %c0_i32 = arith.constant 0 : i32
    %c0_i32_0 = arith.constant 0 : i32
    %c0_i32_1 = arith.constant 0 : i32
    return %c0_i32, %c0_i32_0 : i32, i32
  }
  func.func @transform_3(%arg0: i32) -> (i32, i32) {
    %c0_i32 = arith.constant 0 : i32
    %c0_i32_0 = arith.constant 0 : i32
    %c0_i32_1 = arith.constant 0 : i32
    return %c0_i32, %c0_i32_0 : i32, i32
  }
  func.func @transform_4(%arg0: i32) -> (i32, i32) {
    %c0_i32 = arith.constant 0 : i32
    %c0_i32_0 = arith.constant 0 : i32
    %c0_i32_1 = arith.constant 0 : i32
    return %c0_i32, %c0_i32_0 : i32, i32
  }
  func.func @transform_5(%arg0: i32) -> (i32, i32) {
    %c0_i32 = arith.constant 0 : i32
    %c0_i32_0 = arith.constant 0 : i32
    %c0_i32_1 = arith.constant 0 : i32
    return %c0_i32, %c0_i32_0 : i32, i32
  }
  func.func @transform_6(%arg0: i32) -> (i32, i32) {
    %c0_i32 = arith.constant 0 : i32
    %c0_i32_0 = arith.constant 0 : i32
    %c0_i32_1 = arith.constant 0 : i32
    return %c0_i32, %c0_i32_0 : i32, i32
  }
  func.func @transform_7(%arg0: i32) -> (i32, i32) {
    %c0_i32 = arith.constant 0 : i32
    %c0_i32_0 = arith.constant 0 : i32
    %c0_i32_1 = arith.constant 0 : i32
    return %c0_i32, %c0_i32_0 : i32, i32
  }
  func.func @transform_8(%arg0: i32) -> (i32, i32) {
    %c0_i32 = arith.constant 0 : i32
    %c0_i32_0 = arith.constant 0 : i32
    %c0_i32_1 = arith.constant 0 : i32
    return %c0_i32, %c0_i32_0 : i32, i32
  }
  func.func @transform_9(%arg0: i32) -> (i32, i32) {
    %c0_i32 = arith.constant 0 : i32
    %c0_i32_0 = arith.constant 0 : i32
    %c0_i32_1 = arith.constant 0 : i32
    return %c0_i32, %c0_i32_0 : i32, i32
  }
  func.func @transform_10(%arg0: i32) -> (i32, i32) {
    %c0_i32 = arith.constant 0 : i32
    %c0_i32_0 = arith.constant 0 : i32
    %c0_i32_1 = arith.constant 0 : i32
    return %c0_i32, %c0_i32_0 : i32, i32
  }
  func.func @transform_11(%arg0: i32) -> (i32, i32) {
    %c0_i32 = arith.constant 0 : i32
    %c0_i32_0 = arith.constant 0 : i32
    return %arg0, %c0_i32 : i32, i32
  }
  func.func @transform_12(%arg0: i32) -> (i32, i32) {
    %c0_i32 = arith.constant 0 : i32
    %c0_i32_0 = arith.constant 0 : i32
    return %arg0, %c0_i32 : i32, i32
  }
}

module attributes {stable_mosaic.version = 11 : i64} {
  func.func @fusion_kernel(%arg0: i32, %arg1: memref<16x128xbf16, #tpu.memory_space<vmem>>, %arg2: memref<16x128xbf16, #tpu.memory_space<vmem>>, %arg3: memref<128x128xbf16, #tpu.memory_space<vmem>>, %arg4: memref<1x128xf32, #tpu.memory_space<vmem>>, %arg5: memref<128x128xbf16, #tpu.memory_space<vmem>>, %arg6: memref<1x128xf32, #tpu.memory_space<vmem>>, %arg7: memref<128x128xbf16, #tpu.memory_space<vmem>>, %arg8: memref<128x128xbf16, #tpu.memory_space<vmem>>, %arg9: memref<1x128xf32, #tpu.memory_space<vmem>>, %arg10: memref<128x128xbf16, #tpu.memory_space<vmem>>, %arg11: memref<1x128xf32, #tpu.memory_space<vmem>>, %arg12: memref<16x128xf32, #tpu.memory_space<vmem>>, %arg13: memref<16x128xbf16, #tpu.memory_space<vmem>>) attributes {dimension_semantics = [#tpu.dimension_semantics<arbitrary>], iteration_bounds = array<i64: 1>, scalar_prefetch = 0 : i64, scratch_operands = 0 : i64, tpu.core_type = #tpu.core_type<tc>, window_params = [{transform_indices = @transform_0, window_bounds = array<i64: 16, 128>}, {transform_indices = @transform_1, window_bounds = array<i64: 16, 128>}, {pipeline_mode = #tpu.pipeline_mode<synchronous>, transform_indices = @transform_2, window_bounds = array<i64: 128, 128>}, {pipeline_mode = #tpu.pipeline_mode<synchronous>, transform_indices = @transform_3, window_bounds = array<i64: 1, 128>}, {pipeline_mode = #tpu.pipeline_mode<synchronous>, transform_indices = @transform_4, window_bounds = array<i64: 128, 128>}, {pipeline_mode = #tpu.pipeline_mode<synchronous>, transform_indices = @transform_5, window_bounds = array<i64: 1, 128>}, {pipeline_mode = #tpu.pipeline_mode<synchronous>, transform_indices = @transform_6, window_bounds = array<i64: 128, 128>}, {pipeline_mode = #tpu.pipeline_mode<synchronous>, transform_indices = @transform_7, window_bounds = array<i64: 128, 128>}, {pipeline_mode = #tpu.pipeline_mode<synchronous>, transform_indices = @transform_8, window_bounds = array<i64: 1, 128>}, {pipeline_mode = #tpu.pipeline_mode<synchronous>, transform_indices = @transform_9, window_bounds = array<i64: 128, 128>}, {pipeline_mode = #tpu.pipeline_mode<synchronous>, transform_indices = @transform_10, window_bounds = array<i64: 1, 128>}, {transform_indices = @transform_11, window_bounds = array<i64: 16, 128>}, {transform_indices = @transform_12, window_bounds = array<i64: 16, 128>}]} {
    %c0 = arith.constant 0 : index
    %c0_0 = arith.constant 0 : index
    %0 = vector.load %arg1[%c0, %c0_0] : memref<16x128xbf16, #tpu.memory_space<vmem>>, vector<16x128xbf16>
    %c0_1 = arith.constant 0 : index
    %c0_2 = arith.constant 0 : index
    %1 = vector.load %arg2[%c0_1, %c0_2] : memref<16x128xbf16, #tpu.memory_space<vmem>>, vector<16x128xbf16>
    %c0_3 = arith.constant 0 : index
    %c0_4 = arith.constant 0 : index
    %2 = vector.load %arg3[%c0_3, %c0_4] : memref<128x128xbf16, #tpu.memory_space<vmem>>, vector<128x128xbf16>
    %cst = arith.constant dense<0.000000e+00> : vector<16x128xf32>
    %3 = tpu.matmul %0, %2, %cst {dimension_numbers = #tpu.dot_dimension_numbers<[1], [0], [0], [1], [0, 0, 1, 1], [], []>} : vector<16x128xbf16>, vector<128x128xbf16>, vector<16x128xf32> -> vector<16x128xf32>
    %c0_5 = arith.constant 0 : index
    %c0_6 = arith.constant 0 : index
    %4 = vector.load %arg4[%c0_5, %c0_6] : memref<1x128xf32, #tpu.memory_space<vmem>>, vector<1x128xf32>
    %5 = vector.broadcast %4 : vector<1x128xf32> to vector<16x128xf32>
    %6 = arith.addf %3, %5 : vector<16x128xf32>
    %7 = arith.negf %6 : vector<16x128xf32>
    %8 = math.exp %7 : vector<16x128xf32>
    %cst_7 = arith.constant 1.000000e+00 : f32
    %9 = vector.broadcast %cst_7 : f32 to vector<16x128xf32>
    %10 = arith.addf %9, %8 : vector<16x128xf32>
    %11 = arith.divf %9, %10 : vector<16x128xf32>
    %c0_8 = arith.constant 0 : index
    %c0_9 = arith.constant 0 : index
    %12 = vector.load %arg5[%c0_8, %c0_9] : memref<128x128xbf16, #tpu.memory_space<vmem>>, vector<128x128xbf16>
    %cst_10 = arith.constant dense<0.000000e+00> : vector<16x128xf32>
    %13 = tpu.matmul %1, %12, %cst_10 {dimension_numbers = #tpu.dot_dimension_numbers<[1], [0], [0], [1], [0, 0, 1, 1], [], []>} : vector<16x128xbf16>, vector<128x128xbf16>, vector<16x128xf32> -> vector<16x128xf32>
    %c0_11 = arith.constant 0 : index
    %c0_12 = arith.constant 0 : index
    %14 = vector.load %arg6[%c0_11, %c0_12] : memref<1x128xf32, #tpu.memory_space<vmem>>, vector<1x128xf32>
    %15 = vector.broadcast %14 : vector<1x128xf32> to vector<16x128xf32>
    %16 = arith.addf %13, %15 : vector<16x128xf32>
    %17 = arith.negf %16 : vector<16x128xf32>
    %18 = math.exp %17 : vector<16x128xf32>
    %cst_13 = arith.constant 1.000000e+00 : f32
    %19 = vector.broadcast %cst_13 : f32 to vector<16x128xf32>
    %20 = arith.addf %19, %18 : vector<16x128xf32>
    %21 = arith.divf %19, %20 : vector<16x128xf32>
    %22 = arith.extf %0 : vector<16x128xbf16> to vector<16x128xf32>
    %23 = arith.mulf %11, %22 : vector<16x128xf32>
    %24 = arith.truncf %23 : vector<16x128xf32> to vector<16x128xbf16>
    %25 = arith.extf %1 : vector<16x128xbf16> to vector<16x128xf32>
    %26 = arith.mulf %21, %25 : vector<16x128xf32>
    %27 = arith.truncf %26 : vector<16x128xf32> to vector<16x128xbf16>
    %c0_14 = arith.constant 0 : index
    %c0_15 = arith.constant 0 : index
    %28 = vector.load %arg7[%c0_14, %c0_15] : memref<128x128xbf16, #tpu.memory_space<vmem>>, vector<128x128xbf16>
    %cst_16 = arith.constant dense<0.000000e+00> : vector<16x128xf32>
    %29 = tpu.matmul %24, %28, %cst_16 {dimension_numbers = #tpu.dot_dimension_numbers<[1], [0], [0], [1], [0, 0, 1, 1], [], []>} : vector<16x128xbf16>, vector<128x128xbf16>, vector<16x128xf32> -> vector<16x128xf32>
    %c0_17 = arith.constant 0 : index
    %c0_18 = arith.constant 0 : index
    %30 = vector.load %arg8[%c0_17, %c0_18] : memref<128x128xbf16, #tpu.memory_space<vmem>>, vector<128x128xbf16>
    %cst_19 = arith.constant dense<0.000000e+00> : vector<16x128xf32>
    %31 = tpu.matmul %27, %30, %cst_19 {dimension_numbers = #tpu.dot_dimension_numbers<[1], [0], [0], [1], [0, 0, 1, 1], [], []>} : vector<16x128xbf16>, vector<128x128xbf16>, vector<16x128xf32> -> vector<16x128xf32>
    %32 = arith.addf %29, %31 : vector<16x128xf32>
    %c0_20 = arith.constant 0 : index
    %c0_21 = arith.constant 0 : index
    %33 = vector.load %arg9[%c0_20, %c0_21] : memref<1x128xf32, #tpu.memory_space<vmem>>, vector<1x128xf32>
    %34 = vector.broadcast %33 : vector<1x128xf32> to vector<16x128xf32>
    %35 = arith.addf %32, %34 : vector<16x128xf32>
    %cst_22 = arith.constant 0.000000e+00 : f32
    %36 = vector.broadcast %cst_22 : f32 to vector<16x128xf32>
    %37 = arith.maximumf %35, %36 : vector<16x128xf32>
    %38 = arith.truncf %37 : vector<16x128xf32> to vector<16x128xbf16>
    %c0_23 = arith.constant 0 : index
    %c0_24 = arith.constant 0 : index
    %39 = vector.load %arg13[%c0_23, %c0_24] : memref<16x128xbf16, #tpu.memory_space<vmem>>, vector<16x128xbf16>
    tpu.vector_store %arg13[%c0_23, %c0_24], %38 {strides = array<i32>} : memref<16x128xbf16, #tpu.memory_space<vmem>>, vector<16x128xbf16>,
    %40 = arith.truncf %37 : vector<16x128xf32> to vector<16x128xbf16>
    %c0_25 = arith.constant 0 : index
    %c0_26 = arith.constant 0 : index
    %41 = vector.load %arg10[%c0_25, %c0_26] : memref<128x128xbf16, #tpu.memory_space<vmem>>, vector<128x128xbf16>
    %cst_27 = arith.constant dense<0.000000e+00> : vector<16x128xf32>
    %42 = tpu.matmul %40, %41, %cst_27 {dimension_numbers = #tpu.dot_dimension_numbers<[1], [0], [0], [1], [0, 0, 1, 1], [], []>} : vector<16x128xbf16>, vector<128x128xbf16>, vector<16x128xf32> -> vector<16x128xf32>
    %c0_28 = arith.constant 0 : index
    %c0_29 = arith.constant 0 : index
    %43 = vector.load %arg11[%c0_28, %c0_29] : memref<1x128xf32, #tpu.memory_space<vmem>>, vector<1x128xf32>
    %44 = vector.broadcast %43 : vector<1x128xf32> to vector<16x128xf32>
    %45 = arith.addf %42, %44 : vector<16x128xf32>
    %c0_30 = arith.constant 0 : index
    %c0_31 = arith.constant 0 : index
    %46 = vector.load %arg12[%c0_30, %c0_31] : memref<16x128xf32, #tpu.memory_space<vmem>>, vector<16x128xf32>
    tpu.vector_store %arg12[%c0_30, %c0_31], %45 {strides = array<i32>} : memref<16x128xf32, #tpu.memory_space<vmem>>, vector<16x128xf32>,
    return
  }
  func.func @transform_0(%arg0: i32) -> (i32, i32) {
    %c0_i32 = arith.constant 0 : i32
    %c0_i32_0 = arith.constant 0 : i32
    return %arg0, %c0_i32 : i32, i32
  }
  func.func @transform_1(%arg0: i32) -> (i32, i32) {
    %c0_i32 = arith.constant 0 : i32
    %c0_i32_0 = arith.constant 0 : i32
    return %arg0, %c0_i32 : i32, i32
  }
  func.func @transform_2(%arg0: i32) -> (i32, i32) {
    %c0_i32 = arith.constant 0 : i32
    %c0_i32_0 = arith.constant 0 : i32
    %c0_i32_1 = arith.constant 0 : i32
    return %c0_i32, %c0_i32_0 : i32, i32
  }
  func.func @transform_3(%arg0: i32) -> (i32, i32) {
    %c0_i32 = arith.constant 0 : i32
    %c0_i32_0 = arith.constant 0 : i32
    %c0_i32_1 = arith.constant 0 : i32
    return %c0_i32, %c0_i32_0 : i32, i32
  }
  func.func @transform_4(%arg0: i32) -> (i32, i32) {
    %c0_i32 = arith.constant 0 : i32
    %c0_i32_0 = arith.constant 0 : i32
    %c0_i32_1 = arith.constant 0 : i32
    return %c0_i32, %c0_i32_0 : i32, i32
  }
  func.func @transform_5(%arg0: i32) -> (i32, i32) {
    %c0_i32 = arith.constant 0 : i32
    %c0_i32_0 = arith.constant 0 : i32
    %c0_i32_1 = arith.constant 0 : i32
    return %c0_i32, %c0_i32_0 : i32, i32
  }
  func.func @transform_6(%arg0: i32) -> (i32, i32) {
    %c0_i32 = arith.constant 0 : i32
    %c0_i32_0 = arith.constant 0 : i32
    %c0_i32_1 = arith.constant 0 : i32
    return %c0_i32, %c0_i32_0 : i32, i32
  }
  func.func @transform_7(%arg0: i32) -> (i32, i32) {
    %c0_i32 = arith.constant 0 : i32
    %c0_i32_0 = arith.constant 0 : i32
    %c0_i32_1 = arith.constant 0 : i32
    return %c0_i32, %c0_i32_0 : i32, i32
  }
  func.func @transform_8(%arg0: i32) -> (i32, i32) {
    %c0_i32 = arith.constant 0 : i32
    %c0_i32_0 = arith.constant 0 : i32
    %c0_i32_1 = arith.constant 0 : i32
    return %c0_i32, %c0_i32_0 : i32, i32
  }
  func.func @transform_9(%arg0: i32) -> (i32, i32) {
    %c0_i32 = arith.constant 0 : i32
    %c0_i32_0 = arith.constant 0 : i32
    %c0_i32_1 = arith.constant 0 : i32
    return %c0_i32, %c0_i32_0 : i32, i32
  }
  func.func @transform_10(%arg0: i32) -> (i32, i32) {
    %c0_i32 = arith.constant 0 : i32
    %c0_i32_0 = arith.constant 0 : i32
    %c0_i32_1 = arith.constant 0 : i32
    return %c0_i32, %c0_i32_0 : i32, i32
  }
  func.func @transform_11(%arg0: i32) -> (i32, i32) {
    %c0_i32 = arith.constant 0 : i32
    %c0_i32_0 = arith.constant 0 : i32
    return %arg0, %c0_i32 : i32, i32
  }
  func.func @transform_12(%arg0: i32) -> (i32, i32) {
    %c0_i32 = arith.constant 0 : i32
    %c0_i32_0 = arith.constant 0 : i32
    return %arg0, %c0_i32 : i32, i32
  }
}

</mosaic_0001>

<bundles_post_ra>
// kernel: tpu_custom_call.1
= control target key start
LH: loop header
LB: loop body
LE: loop exit
PB: predicated region body
PF: predicated region fallthrough
CT: control target
= control target key end

     0   :  { %18 = vsyncpa [#allocation3], 0  ;;  %s1587_s0 = inlined_call_operand.hbm [shape: bf16[16,128], index: 0, kind: input, shape index: {}]   ;;  %s1588_s1 = inlined_call_operand.hbm [shape: bf16[16,128], index: 1, kind: input, shape index: {}]   ;;  %s1589_s2 = inlined_call_operand.hbm [shape: bf16[128,128], index: 2, kind: input, shape index: {}]   ;;  %s1590_s3 = inlined_call_operand.vmem [shape: f32[1,128], index: 3, kind: input, shape index: {}]   ;;  %s1591_s4 = inlined_call_operand.hbm [shape: bf16[128,128], index: 4, kind: input, shape index: {}]   ;;  %s1592_s5 = inlined_call_operand.vmem [shape: f32[1,128], index: 5, kind: input, shape index: {}]   ;;  %s1593_s6 = inlined_call_operand.hbm [shape: bf16[128,128], index: 6, kind: input, shape index: {}]   ;;  %s1594_s7 = inlined_call_operand.hbm [shape: bf16[128,128], index: 7, kind: input, shape index: {}]   ;;  %s1595_s8 = inlined_call_operand.vmem [shape: f32[1,128], index: 8, kind: input, shape index: {}]   ;;  %s1596_s9 = inlined_call_operand.hbm [shape: bf16[128,128], index: 9, kind: input, shape index: {}]   ;;  %s1597_s10 = inlined_call_operand.vmem [shape: f32[1,128], index: 10, kind: input, shape index: {}]   ;;  %s1598_s11 = inlined_call_operand.hbm [shape: f32[16,128], index: 11, kind: output, shape index: {0}]   ;;  %s1599_s12 = inlined_call_operand.hbm [shape: bf16[16,128], index: 12, kind: output, shape index: {1}]  }
   0x1   :  { %19 = vsyncpa [#allocation6], 0 }
   0x2   :  { %20 = vsyncpa [#allocation9], 0 }
   0x3   :  { %21 = vsyncpa [#allocation12], 0 }
   0x4   :  { %22 = vsyncpa [#allocation4], 0 }
   0x5   :  { %23 = vsyncpa [#allocation16], 0  ;;  %s1282_s21 = smov [#allocation5]   ;;  %s1283_s23 = smov [#allocation8]  }
   0x6   :  { %s41_s22 = sshll.u32 %s1282_s21, 4  ;;  %s67_s24 = sshll.u32 %s1283_s23, 4  ;;  %s42_s22 = int_to_ptr.vmem [resolvable:$true] %s41_s22  ;;  %s1362_s24 = int_to_ptr.vmem [resolvable:$true] %s67_s24 }
   0x7   :  { %s1072_s27 = scalar_lea.hbm %s1588_s1, 128 }
   0x8   :  { %p1073_p0 = scmp.ne.s32.totalorder %s1588_s1, %s1072_s27  ;;  %p1076_p1 = scmp.lt.u32.totalorder %s1072_s27, %s1588_s1 }
   0xa   :  { %p1078_p2 = pnand %p1076_p1, %p1073_p0 }
   0xc   :  { %1081 = shalt.err (!%p1078_p2)
}
   0xd   :  { %s1082_s14 = scalar_lea.vmem %s42_s22, 128  ;;  %p1087_p4 = scmp.lt.s32.totalorder %s42_s22, %s42_s22 }
   0xe   :  { %p1083_p3 = scmp.ne.s32.totalorder %s42_s22, %s1082_s14  ;;  %p1088_p5 = scmp.lt.s32.totalorder %s1082_s14, %s1082_s14 }
  0x10   :  { %p1089_p6 = por %p1088_p5, %p1087_p4 }
  0x12   :  { %p1090_p7 = pnand %p1089_p6, %p1083_p3 }
  0x14   :  { %1093 = shalt.err (!%p1090_p7)
}
  0x15   :  { %s1284_s15 = smov 64   ;;  %s1285_s16 = smov 4  }
  0x16   :  { %47 = dma.hbm_to_vmem [thread:$0]  %s1588_s1, 128, %s42_s22, [#allocation6], %s1284_s15, %s1284_s15, %s1285_s16  }
  0x17   :  { %s1094_s21 = scalar_lea.hbm %s1591_s4, 1024 }
  0x18   :  { %p1095_p8 = scmp.ne.s32.totalorder %s1591_s4, %s1094_s21  ;;  %p1098_p9 = scmp.lt.u32.totalorder %s1094_s21, %s1591_s4 }
  0x1a   :  { %p1100_p10 = pnand %p1098_p9, %p1095_p8 }
  0x1c   :  { %1103 = shalt.err (!%p1100_p10)
}
  0x1d   :  { %s1104_s28 = scalar_lea.vmem %s1362_s24, 1024  ;;  %p1109_p12 = scmp.lt.s32.totalorder %s1362_s24, %s1362_s24 }
  0x1e   :  { %p1105_p11 = scmp.ne.s32.totalorder %s1362_s24, %s1104_s28  ;;  %p1110_p13 = scmp.lt.s32.totalorder %s1104_s28, %s1104_s28 }
  0x20   :  { %p1111_p0 = por %p1110_p13, %p1109_p12 }
  0x22   :  { %p1112_p1 = pnand %p1111_p0, %p1105_p11 }
  0x24   :  { %1115 = shalt.err (!%p1112_p1)
}
  0x25   :  { %73 = dma.hbm_to_vmem [thread:$0]  %s1591_s4, 1024, %s1362_s24, [#allocation9], %s1284_s15, %s1284_s15, %s1285_s16  }
  0x26   :  { %s1286_s29 = smov [#allocation11]   ;;  %s1287_s13 = smov [#allocation2]  }
  0x27   :  { %s93_s30 = sshll.u32 %s1286_s29, 4  ;;  %s29_s14 = sshll.u32 %s1287_s13, 4  ;;  %s94_s30 = int_to_ptr.vmem [resolvable:$true] %s93_s30  ;;  %s1399_s14 = int_to_ptr.vmem [resolvable:$true] %s29_s14 }
  0x28   :  { %s1116_s19 = scalar_lea.hbm %s1594_s7, 1024 }
  0x29   :  { %p1117_p2 = scmp.ne.s32.totalorder %s1594_s7, %s1116_s19  ;;  %p1120_p3 = scmp.lt.u32.totalorder %s1116_s19, %s1594_s7 }
  0x2b   :  { %p1122_p4 = pnand %p1120_p3, %p1117_p2 }
  0x2d   :  { %1125 = shalt.err (!%p1122_p4)
}
  0x2e   :  { %s1126_s4 = scalar_lea.vmem %s94_s30, 1024  ;;  %p1131_p6 = scmp.lt.s32.totalorder %s94_s30, %s94_s30 }
  0x2f   :  { %p1127_p5 = scmp.ne.s32.totalorder %s94_s30, %s1126_s4  ;;  %p1132_p7 = scmp.lt.s32.totalorder %s1126_s4, %s1126_s4 }
  0x31   :  { %p1133_p8 = por %p1132_p7, %p1131_p6 }
  0x33   :  { %p1134_p9 = pnand %p1133_p8, %p1127_p5 }
  0x35   :  { %1137 = shalt.err (!%p1134_p9)
}
  0x36   :  { %99 = dma.hbm_to_vmem [thread:$0]  %s1594_s7, 1024, %s94_s30, [#allocation12], %s1284_s15, %s1284_s15, %s1285_s16  }
  0x37   :  { %s1138_s1 = scalar_lea.hbm %s1587_s0, 128 }
  0x38   :  { %p1139_p10 = scmp.ne.s32.totalorder %s1587_s0, %s1138_s1  ;;  %p1142_p11 = scmp.lt.u32.totalorder %s1138_s1, %s1587_s0 }
  0x3a   :  { %p1144_p12 = pnand %p1142_p11, %p1139_p10 }
  0x3c   :  { %1147 = shalt.err (!%p1144_p12)
}
  0x3d   :  { %s1148_s18 = scalar_lea.vmem %s1399_s14, 128  ;;  %p1153_p0 = scmp.lt.s32.totalorder %s1399_s14, %s1399_s14 }
  0x3e   :  { %p1149_p13 = scmp.ne.s32.totalorder %s1399_s14, %s1148_s18  ;;  %p1154_p1 = scmp.lt.s32.totalorder %s1148_s18, %s1148_s18 }
  0x40   :  { %p1155_p2 = por %p1154_p1, %p1153_p0 }
  0x42   :  { %p1156_p3 = pnand %p1155_p2, %p1149_p13 }
  0x44   :  { %1159 = shalt.err (!%p1156_p3)
}
  0x45   :  { %35 = dma.hbm_to_vmem [thread:$0]  %s1587_s0, 128, %s1399_s14, [#allocation3], %s1284_s15, %s1284_s15, %s1285_s16  }
  0x46   :  { %s1288_s19 = smov [#allocation7]   ;;  %s1289_s21 = smov [#allocation10]  }
  0x47   :  { %s53_s20 = sshll.u32 %s1288_s19, 4  ;;  %s81_s23 = sshll.u32 %s1289_s21, 4  ;;  %s54_s20 = int_to_ptr.vmem [resolvable:$true] %s53_s20  ;;  %s1436_s23 = int_to_ptr.vmem [resolvable:$true] %s81_s23 }
  0x48   :  { %s1160_s24 = scalar_lea.hbm %s1589_s2, 1024 }
  0x49   :  { %p1161_p4 = scmp.ne.s32.totalorder %s1589_s2, %s1160_s24  ;;  %p1164_p5 = scmp.lt.u32.totalorder %s1160_s24, %s1589_s2 }
  0x4b   :  { %p1166_p6 = pnand %p1164_p5, %p1161_p4 }
  0x4d   :  { %1169 = shalt.err (!%p1166_p6)
}
  0x4e   :  { %s1170_s0 = scalar_lea.vmem %s54_s20, 1024  ;;  %p1175_p8 = scmp.lt.s32.totalorder %s54_s20, %s54_s20 }
  0x4f   :  { %p1171_p7 = scmp.ne.s32.totalorder %s54_s20, %s1170_s0  ;;  %p1176_p9 = scmp.lt.s32.totalorder %s1170_s0, %s1170_s0 }
  0x51   :  { %p1177_p10 = por %p1176_p9, %p1175_p8 }
  0x53   :  { %p1178_p11 = pnand %p1177_p10, %p1171_p7 }
  0x55   :  { %1181 = shalt.err (!%p1178_p11)
}
  0x56   :  { %59 = dma.hbm_to_vmem [thread:$0]  %s1589_s2, 1024, %s54_s20, [#allocation6], %s1284_s15, %s1284_s15, %s1285_s16  }
  0x57   :  { %s1182_s17 = scalar_lea.hbm %s1593_s6, 1024 }
  0x58   :  { %p1183_p12 = scmp.ne.s32.totalorder %s1593_s6, %s1182_s17  ;;  %p1186_p13 = scmp.lt.u32.totalorder %s1182_s17, %s1593_s6 }
  0x5a   :  { %p1188_p0 = pnand %p1186_p13, %p1183_p12 }
  0x5c   :  { %1191 = shalt.err (!%p1188_p0)
}
  0x5d   :  { %s1192_s21 = scalar_lea.vmem %s1436_s23, 1024  ;;  %p1197_p2 = scmp.lt.s32.totalorder %s1436_s23, %s1436_s23 }
  0x5e   :  { %p1193_p1 = scmp.ne.s32.totalorder %s1436_s23, %s1192_s21  ;;  %p1198_p3 = scmp.lt.s32.totalorder %s1192_s21, %s1192_s21 }
  0x60   :  { %p1199_p4 = por %p1198_p3, %p1197_p2 }
  0x62   :  { %p1200_p5 = pnand %p1199_p4, %p1193_p1 }
  0x64   :  { %1203 = shalt.err (!%p1200_p5)
}
  0x65   :  { %87 = dma.hbm_to_vmem [thread:$0]  %s1593_s6, 1024, %s1436_s23, [#allocation9], %s1284_s15, %s1284_s15, %s1285_s16  }
  0x66   :  { %s1290_s25 = smov [#allocation13]   ;;  %s1204_s27 = scalar_lea.hbm %s1596_s9, 1024 }
  0x67   :  { %s107_s4 = sshll.u32 %s1290_s25, 4  ;;  %p1205_p6 = scmp.ne.s32.totalorder %s1596_s9, %s1204_s27  ;;  %s108_s4 = int_to_ptr.vmem [resolvable:$true] %s107_s4 }
  0x68   :  { %p1208_p7 = scmp.lt.u32.totalorder %s1204_s27, %s1596_s9 }
  0x6a   :  { %p1210_p8 = pnand %p1208_p7, %p1205_p6 }
  0x6c   :  { %1213 = shalt.err (!%p1210_p8)
}
  0x6d   :  { %s1214_s22 = scalar_lea.vmem %s108_s4, 1024  ;;  %p1219_p10 = scmp.lt.s32.totalorder %s108_s4, %s108_s4 }
  0x6e   :  { %p1215_p9 = scmp.ne.s32.totalorder %s108_s4, %s1214_s22  ;;  %p1220_p11 = scmp.lt.s32.totalorder %s1214_s22, %s1214_s22 }
  0x70   :  { %p1221_p12 = por %p1220_p11, %p1219_p10 }
  0x72   :  { %p1222_p13 = pnand %p1221_p12, %p1215_p9 }
  0x74   :  { %1225 = shalt.err (!%p1222_p13)
}
  0x75   :  { %113 = dma.hbm_to_vmem [thread:$0]  %s1596_s9, 1024, %s108_s4, [#allocation12], %s1284_s15, %s1284_s15, %s1285_s16  }
  0x76   :  { %1270 = dma.done.wait [#allocation3], 128  }
  0x77   :  { %1271 = vsyncadd [#allocation3], 4294967168 }
  0x78   :  { %1272 = dma.done.wait [#allocation6], 1152  }
  0x79   :  { %1273 = vsyncadd [#allocation6], 4294966144 }
  0x7a   :  { %1274 = dma.done.wait [#allocation9], 2048  }
  0x7b   :  { %1275 = vsyncadd [#allocation9], 4294965248 }
  0x7c   :  { %1276 = dma.done.wait [#allocation12], 2048  }
  0x7d   :  { %1277 = vsyncadd [#allocation12], 4294965248  ;;  %v1291_v0 = vmov 0.0   ;;  %vm1292_vm0 = vmmov 0   ;;  %v1012_v1 = vld [vmem:[#allocation7] sm:$0xff]   ;;  %v1014_v3 = vld [vmem:[#allocation7 + $0x8] sm:$0xff]  }
  0x7e   :  { %897 = vmatprep.subr.bf16.mxu0 %v1291_v0  ;;  %917 = vmatprep.subr.bf16.mxu1 %v1291_v0  ;;  %v1013_v2 = vld [vmem:[#allocation8] sm:$0xff]   ;;  %v1015_v4 = vld [vmem:[#allocation8 + $0x8] sm:$0xff]   ;;  %v1016_v5 = vld [vmem:[#allocation7 + $0x10] sm:$0xff]   ;;  %s1293_s18 = smov [#allocation15]  }
  0x7f   :  { %913 = vmatprep.mubr.msk.bf16.mxu0 %vm1292_vm0, %v1291_v0  ;;  %933 = vmatprep.mubr.msk.bf16.mxu1 %vm1292_vm0, %v1291_v0  ;;  %v1017_v6 = vld [vmem:[#allocation8 + $0x10] sm:$0xff]   ;;  %v1018_v7 = vld [vmem:[#allocation7 + $0x18] sm:$0xff]   ;;  %v1020_v9 = vld [vmem:[#allocation7 + $0x20] sm:$0xff]   ;;  %s774_s7 = sshll.u32 %s1293_s18, 4  ;;  %s775_s7 = int_to_ptr.vmem [resolvable:$true] %s774_s7 }
  0x80   :  { %898 = vmatpush3.bf16.msra.mxu0 %v1012_v1  ;;  %918 = vmatpush3.bf16.msra.mxu1 %v1013_v2  ;;  %v1019_v8 = vld [vmem:[#allocation8 + $0x18] sm:$0xff]   ;;  %v1021_v10 = vld [vmem:[#allocation8 + $0x20] sm:$0xff]   ;;  %v1022_v11 = vld [vmem:[#allocation7 + $0x28] sm:$0xff]   ;;  %s1226_s30 = scalar_lea.vmem %s775_s7, 128  ;;  %p1231_p1 = scmp.lt.s32.totalorder %s775_s7, %s775_s7 }
  0x81   :  { %899 = vmatprep.subr.bf16.mxu0 %v1291_v0  ;;  %919 = vmatprep.subr.bf16.mxu1 %v1291_v0  ;;  %v1023_v12 = vld [vmem:[#allocation8 + $0x28] sm:$0xff]   ;;  %v1024_v13 = vld [vmem:[#allocation7 + $0x30] sm:$0xff]   ;;  %v1026_v15 = vld [vmem:[#allocation7 + $0x38] sm:$0xff]   ;;  %p1227_p0 = scmp.ne.s32.totalorder %s775_s7, %s1226_s30  ;;  %p1232_p2 = scmp.lt.s32.totalorder %s1226_s30, %s1226_s30 }
  0x82   :  { %v1025_v14 = vld [vmem:[#allocation8 + $0x30] sm:$0xff]   ;;  %v1027_v17 = vld [vmem:[#allocation8 + $0x38] sm:$0xff]   ;;  %v1030_v19 = vld [vmem:[#allocation11] sm:$0xff]  }
  0x83   :  { %v1506_v16 = vld [vmem:[#allocation2] sm:$0xff]   ;;  %v1508_v18 = vld [vmem:[#allocation5] sm:$0xff]   ;;  %v1031_v20 = vld [vmem:[#allocation10] sm:$0xff]   ;;  %p1233_p3 = por %p1232_p2, %p1231_p1 }
  0x84   :  { %900 = vmatpush3.bf16.msra.mxu0 %v1014_v3  ;;  %920 = vmatpush3.bf16.msra.mxu1 %v1015_v4  ;;  %v1032_v21 = vld [vmem:[#allocation11 + $0x8] sm:$0xff]   ;;  %v1034_v23 = vld [vmem:[#allocation11 + $0x10] sm:$0xff]   ;;  %v1036_v25 = vld [vmem:[#allocation11 + $0x18] sm:$0xff]   ;;  %v402_v61 = vunpack.c.l.bf16 %v1506_v16  ;;  %v407_v62 = vunpack.c.l.bf16 %v1508_v18  ;;  %v403_v63 = vunpack.c.h.bf16 %v1506_v16  ;;  %v408_v2 = vunpack.c.h.bf16 %v1508_v18 }
  0x85   :  { %901 = vmatprep.subr.bf16.mxu0 %v1291_v0  ;;  %921 = vmatprep.subr.bf16.mxu1 %v1291_v0  ;;  %v1033_v22 = vld [vmem:[#allocation10 + $0x8] sm:$0xff]   ;;  %v1035_v24 = vld [vmem:[#allocation10 + $0x10] sm:$0xff]   ;;  %v1037_v26 = vld [vmem:[#allocation10 + $0x18] sm:$0xff]   ;;  %p1234_p4 = pnand %p1233_p3, %p1227_p0 }
  0x86   :  { %v1038_v27 = vld [vmem:[#allocation11 + $0x20] sm:$0xff]   ;;  %v1040_v29 = vld [vmem:[#allocation11 + $0x28] sm:$0xff]   ;;  %v1042_v31 = vld [vmem:[#allocation11 + $0x30] sm:$0xff]  }
  0x87   :  { %v1039_v28 = vld [vmem:[#allocation10 + $0x20] sm:$0xff]   ;;  %v1041_v30 = vld [vmem:[#allocation10 + $0x28] sm:$0xff]   ;;  %v1043_v32 = vld [vmem:[#allocation10 + $0x30] sm:$0xff]  }
  0x88   :  { %902 = vmatpush3.bf16.msra.mxu0 %v1016_v5  ;;  %922 = vmatpush3.bf16.msra.mxu1 %v1017_v6  ;;  %v1044_v33 = vld [vmem:[#allocation11 + $0x38] sm:$0xff]   ;;  %v793_v35 = vld [vmem:[%s1590_s3] ss:$0 sm:$0xff] }
  0x89   :  { %903 = vmatprep.subr.bf16.mxu0 %v1291_v0  ;;  %923 = vmatprep.subr.bf16.mxu1 %v1291_v0  ;;  %v1045_v34 = vld [vmem:[#allocation10 + $0x38] sm:$0xff]   ;;  %v805_v36 = vld [vmem:[%s1592_s5] ss:$0 sm:$0xff] }
  0x8c   :  { %904 = vmatpush3.bf16.msra.mxu0 %v1018_v7  ;;  %924 = vmatpush3.bf16.msra.mxu1 %v1019_v8 }
  0x8d   :  { %905 = vmatprep.subr.bf16.mxu0 %v1291_v0  ;;  %925 = vmatprep.subr.bf16.mxu1 %v1291_v0 }
  0x90   :  { %906 = vmatpush3.bf16.msra.mxu0 %v1020_v9  ;;  %926 = vmatpush3.bf16.msra.mxu1 %v1021_v10 }
  0x91   :  { %907 = vmatprep.subr.bf16.mxu0 %v1291_v0  ;;  %927 = vmatprep.subr.bf16.mxu1 %v1291_v0 }
  0x94   :  { %908 = vmatpush3.bf16.msra.mxu0 %v1022_v11  ;;  %928 = vmatpush3.bf16.msra.mxu1 %v1023_v12  ;;  %v1046_v11 = vld [vmem:[#allocation13] sm:$0xff]  }
  0x95   :  { %909 = vmatprep.subr.bf16.mxu0 %v1291_v0  ;;  %929 = vmatprep.subr.bf16.mxu1 %v1291_v0 }
  0x98   :  { %910 = vmatpush3.bf16.msra.mxu0 %v1024_v13  ;;  %930 = vmatpush3.bf16.msra.mxu1 %v1025_v14  ;;  %v1047_v13 = vld [vmem:[#allocation13 + $0x8] sm:$0xff]   ;;  %v1048_v14 = vld [vmem:[#allocation13 + $0x10] sm:$0xff]  }
  0x99   :  { %911 = vmatprep.subr.bf16.mxu0 %v1291_v0  ;;  %931 = vmatprep.subr.bf16.mxu1 %v1291_v0 }
  0x9c   :  { %912 = vmatpush3.bf16.msra.mxu0 %v1026_v15  ;;  %932 = vmatpush3.bf16.msra.mxu1 %v1027_v17  ;;  %v1049_v15 = vld [vmem:[#allocation13 + $0x18] sm:$0xff]   ;;  %v1051_v17 = vld [vmem:[#allocation13 + $0x28] sm:$0xff]  }
  0x9d   :  { %937 = vmatprep.subr.bf16.mxu0 %v1291_v0  ;;  %957 = vmatprep.subr.bf16.mxu1 %v1291_v0 }
  0x9f   :  { %914 = vmatmul.mubr.bf16.vlgmr.msra.gmra.mrb[0].mxu0 %v1506_v16  ;;  %934 = vmatmul.mubr.bf16.vlgmr.msra.gmra.mrb[0].mxu1 %v1508_v18  ;;  %v1050_v16 = vld [vmem:[#allocation13 + $0x20] sm:$0xff]   ;;  %v1052_v18 = vld [vmem:[#allocation13 + $0x30] sm:$0xff]  }
  0xa0   :  { %953 = vmatprep.mubr.msk.bf16.mxu0 %vm1292_vm0, %v1291_v0  ;;  %973 = vmatprep.mubr.msk.bf16.mxu1 %vm1292_vm0, %v1291_v0 }
  0xa1   :  { %938 = vmatpush3.bf16.msra.mxu0 %v1030_v19  ;;  %958 = vmatpush3.bf16.msra.mxu1 %v1031_v20  ;;  %v1053_v19 = vld [vmem:[#allocation13 + $0x38] sm:$0xff]  }
  0xa2   :  { %939 = vmatprep.subr.bf16.mxu0 %v1291_v0  ;;  %959 = vmatprep.subr.bf16.mxu1 %v1291_v0 }
  0xa5   :  { %940 = vmatpush3.bf16.msra.mxu0 %v1032_v21  ;;  %960 = vmatpush3.bf16.msra.mxu1 %v1033_v22  ;;  %v833_v22 = vld [vmem:[%s1595_s8] ss:$0 sm:$0xff] }
  0xa6   :  { %941 = vmatprep.subr.bf16.mxu0 %v1291_v0  ;;  %961 = vmatprep.subr.bf16.mxu1 %v1291_v0 }
  0xa9   :  { %942 = vmatpush3.bf16.msra.mxu0 %v1034_v23  ;;  %962 = vmatpush3.bf16.msra.mxu1 %v1035_v24 }
  0xaa   :  { %943 = vmatprep.subr.bf16.mxu0 %v1291_v0  ;;  %963 = vmatprep.subr.bf16.mxu1 %v1291_v0 }
  0xad   :  { %944 = vmatpush3.bf16.msra.mxu0 %v1036_v25  ;;  %964 = vmatpush3.bf16.msra.mxu1 %v1037_v26 }
  0xae   :  { %945 = vmatprep.subr.bf16.mxu0 %v1291_v0  ;;  %965 = vmatprep.subr.bf16.mxu1 %v1291_v0 }
  0xb1   :  { %946 = vmatpush3.bf16.msra.mxu0 %v1038_v27  ;;  %966 = vmatpush3.bf16.msra.mxu1 %v1039_v28 }
  0xb2   :  { %947 = vmatprep.subr.bf16.mxu0 %v1291_v0  ;;  %967 = vmatprep.subr.bf16.mxu1 %v1291_v0 }
  0xb5   :  { %948 = vmatpush3.bf16.msra.mxu0 %v1040_v29  ;;  %968 = vmatpush3.bf16.msra.mxu1 %v1041_v30 }
  0xb6   :  { %949 = vmatprep.subr.bf16.mxu0 %v1291_v0  ;;  %969 = vmatprep.subr.bf16.mxu1 %v1291_v0 }
  0xb9   :  { %950 = vmatpush3.bf16.msra.mxu0 %v1042_v31  ;;  %970 = vmatpush3.bf16.msra.mxu1 %v1043_v32 }
  0xba   :  { %951 = vmatprep.subr.bf16.mxu0 %v1291_v0  ;;  %971 = vmatprep.subr.bf16.mxu1 %v1291_v0 }
  0xbd   :  { %952 = vmatpush3.bf16.msra.mxu0 %v1044_v33  ;;  %972 = vmatpush3.bf16.msra.mxu1 %v1045_v34 }
  0xbe   :  { %977 = vmatprep.subr.bf16.mxu0 %v1291_v0 }
 0x172   :  { %v253_v37 = vpop.f32.mrb[0].mxu0  ;;  %v383_v39 = vpop.f32.mrb[0].mxu1 }
 0x173   :  { %v254_v38 = vadd.f32 %v793_v35, %v253_v37  ;;  %v915_v40 = vpop.f32.mrb[1].mxu0  ;;  %v384_v41 = vadd.f32 %v805_v36, %v383_v39  ;;  %v935_v42 = vpop.f32.mrb[1].mxu1 }
 0x174   :  { %v256_v43 = vpop.f32.mrb[2].mxu0  ;;  %v386_v46 = vpop.f32.mrb[2].mxu1 }
 0x175   :  { %v803_v44 = vmul.f32 -1.442695, %v254_v38  ;;  %v257_v45 = vadd.f32 %v793_v35, %v256_v43  ;;  %v916_v47 = vpop.f32.mrb[3].mxu0  ;;  %v815_v48 = vmul.f32 -1.442695, %v384_v41  ;;  %v387_v49 = vadd.f32 %v805_v36, %v386_v46  ;;  %v936_v50 = vpop.f32.mrb[3].mxu1 }
 0x177   :  { %1056 = vpow2.f32 %v803_v44  ;;  %v804_v51 = vmul.f32 -1.442695, %v257_v45  ;;  %v816_v52 = vmul.f32 -1.442695, %v387_v49 }
 0x178   :  { %1058 = vpow2.f32 %v815_v48 }
 0x179   :  { %1060 = vpow2.f32 %v804_v51 }
 0x17a   :  { %1062 = vpow2.f32 %v816_v52 }
 0x181   :  { %v1057_v53 = vpop.eup %1056 }
 0x182   :  { %v1059_v54 = vpop.eup %1058  ;;  %v266_v55 = vadd.f32 1.0, %v1057_v53 }
 0x183   :  { %v1061_v56 = vpop.eup %1060  ;;  %v396_v57 = vadd.f32 1.0, %v1059_v54 }
 0x184   :  { %v1063_v58 = vpop.eup %1062  ;;  %1064 = vrcp.f32 %v266_v55  ;;  %v267_v59 = vadd.f32 1.0, %v1061_v56 }
 0x185   :  { %1066 = vrcp.f32 %v396_v57  ;;  %v397_v60 = vadd.f32 1.0, %v1063_v58 }
 0x186   :  { %1068 = vrcp.f32 %v267_v59 }
 0x187   :  { %1070 = vrcp.f32 %v397_v60 }
 0x18e   :  { %v1065_v1 = vpop.eup %1064 }
 0x18f   :  { %v1067_v3 = vpop.eup %1066  ;;  %v404_v4 = vmul.f32 %v1065_v1, %v402_v61 }
 0x190   :  { %v1069_v5 = vpop.eup %1068  ;;  %v409_v6 = vmul.f32 %v1067_v3, %v407_v62 }
 0x191   :  { %v1071_v7 = vpop.eup %1070  ;;  %v405_v8 = vmul.f32 %v1069_v5, %v403_v63 }
 0x192   :  { %v410_v9 = vmul.f32 %v1071_v7, %v408_v2 }
 0x193   :  { %v406_v10 = vpack.c.bf16 %v405_v8, %v404_v4 }
 0x194   :  { %v411_v12 = vpack.c.bf16 %v410_v9, %v409_v6 }
 0x195   :  { %974 = vmatmul.mubr.bf16.vlgmr.msra.gmra.mrb[4].mxu1 %v406_v10 }
 0x196   :  { %954 = vmatmul.mubr.bf16.vlgmr.msra.gmra.mrb[4].mxu0 %v411_v12 }
 0x197   :  { %978 = vmatpush3.bf16.msra.mxu0 %v1046_v11  ;;  %993 = vmatprep.mubr.msk.bf16.mxu0 %vm1292_vm0, %v1291_v0 }
 0x198   :  { %979 = vmatprep.subr.bf16.mxu0 %v1291_v0 }
 0x19b   :  { %980 = vmatpush3.bf16.msra.mxu0 %v1047_v13 }
 0x19c   :  { %981 = vmatprep.subr.bf16.mxu0 %v1291_v0 }
 0x19f   :  { %982 = vmatpush3.bf16.msra.mxu0 %v1048_v14 }
 0x1a0   :  { %983 = vmatprep.subr.bf16.mxu0 %v1291_v0 }
 0x1a3   :  { %984 = vmatpush3.bf16.msra.mxu0 %v1049_v15 }
 0x1a4   :  { %985 = vmatprep.subr.bf16.mxu0 %v1291_v0 }
 0x1a7   :  { %986 = vmatpush3.bf16.msra.mxu0 %v1050_v16 }
 0x1a8   :  { %987 = vmatprep.subr.bf16.mxu0 %v1291_v0 }
 0x1ab   :  { %988 = vmatpush3.bf16.msra.mxu0 %v1051_v17 }
 0x1ac   :  { %989 = vmatprep.subr.bf16.mxu0 %v1291_v0 }
 0x1af   :  { %990 = vmatpush3.bf16.msra.mxu0 %v1052_v18 }
 0x1b0   :  { %991 = vmatprep.subr.bf16.mxu0 %v1291_v0 }
 0x1b3   :  { %992 = vmatpush3.bf16.msra.mxu0 %v1053_v19 }
 0x268   :  { %v615_v20 = vpop.f32.mrb[4].mxu1 }
 0x269   :  { %v526_v21 = vpop.f32.mrb[4].mxu0  ;;  %v975_v23 = vpop.f32.mrb[5].mxu1 }
 0x26a   :  { %v616_v24 = vadd.f32 %v615_v20, %v526_v21  ;;  %v955_v25 = vpop.f32.mrb[5].mxu0  ;;  %v618_v26 = vpop.f32.mrb[6].mxu1 }
 0x26b   :  { %v529_v27 = vpop.f32.mrb[6].mxu0  ;;  %v976_v28 = vpop.f32.mrb[7].mxu1 }
 0x26c   :  { %v629_v29 = vadd.f32 %v833_v22, %v616_v24  ;;  %v619_v30 = vadd.f32 %v618_v26, %v529_v27  ;;  %v956_v31 = vpop.f32.mrb[7].mxu0 }
 0x26e   :  { %v630_v32 = vadd.f32 %v833_v22, %v619_v30  ;;  %v631_v33 = vmax.f32 %v629_v29, 0.0 }
 0x270   :  { %v632_v0 = vmax.f32 %v630_v32, 0.0 }
 0x272   :  { %v633_v34 = vpack.c.bf16 %v632_v0, %v631_v33 }
 0x274   :  { %851 = vst [vmem:[#allocation15] sm:$0xff] %v633_v34   ;;  %994 = vmatmul.mubr.bf16.vlgmr.msra.gmra.mrb[8].mxu0 %v633_v34 }
 0x275   :  { %1237 = shalt.err (!%p1234_p4)
}
 0x276   :  { %s1238_s21 = scalar_lea.hbm %s1599_s12, 128 }
 0x277   :  { %p1239_p5 = scmp.ne.s32.totalorder %s1599_s12, %s1238_s21  ;;  %p1242_p6 = scmp.lt.u32.totalorder %s1238_s21, %s1599_s12 }
 0x279   :  { %p1244_p7 = pnand %p1242_p6, %p1239_p5 }
 0x27b   :  { %1247 = shalt.err (!%p1244_p7)
}
 0x27c   :  { %780 = dma.vmem_to_hbm [thread:$0]  %s775_s7, 128, %s1599_s12, [#allocation16], %s1284_s15, %s1284_s15, %s1285_s16  }
 0x27d   :  { %v836_v35 = vld [vmem:[%s1597_s10] ss:$0 sm:$0xff]  ;;  %s1294_s1 = smov [#allocation14]  }
 0x27e   :  { %s762_s0 = sshll.u32 %s1294_s1, 4  ;;  %s763_s0 = int_to_ptr.vmem [resolvable:$true] %s762_s0 }
 0x27f   :  { %s1248_s14 = scalar_lea.vmem %s763_s0, 256  ;;  %p1253_p9 = scmp.lt.s32.totalorder %s763_s0, %s763_s0 }
 0x280   :  { %p1249_p8 = scmp.ne.s32.totalorder %s763_s0, %s1248_s14  ;;  %p1254_p10 = scmp.lt.s32.totalorder %s1248_s14, %s1248_s14 }
 0x282   :  { %p1255_p11 = por %p1254_p10, %p1253_p9 }
 0x284   :  { %p1256_p12 = pnand %p1255_p11, %p1249_p8 }
 0x347   :  { %v748_v36 = vpop.f32.mrb[8].mxu0 }
 0x348   :  { %v749_v37 = vadd.f32 %v836_v35, %v748_v36  ;;  %v995_v38 = vpop.f32.mrb[9].mxu0 }
 0x349   :  { %v751_v39 = vpop.f32.mrb[10].mxu0 }
 0x34a   :  { %755 = vst [vmem:[#allocation14] sm:$0xff] %v749_v37  ;;  %v752_v40 = vadd.f32 %v836_v35, %v751_v39  ;;  %v996_v41 = vpop.f32.mrb[11].mxu0 }
 0x34c   :  { %756 = vst [vmem:[#allocation14 + $0x8] sm:$0xff] %v752_v40 }
 0x34d   :  { %1259 = shalt.err (!%p1256_p12)
}
 0x34e   :  { %s1260_s15 = scalar_lea.hbm %s1598_s11, 256 }
 0x34f   :  { %p1261_p13 = scmp.ne.s32.totalorder %s1598_s11, %s1260_s15  ;;  %p1264_p0 = scmp.lt.u32.totalorder %s1260_s15, %s1598_s11 }
 0x351   :  { %p1266_p1 = pnand %p1264_p0, %p1261_p13 }
 0x353   :  { %1269 = shalt.err (!%p1266_p1)
}
 0x354   :  { %s1295_s9 = smov 128   ;;  %s1296_s29 = smov 8  }
 0x355   :  { %768 = dma.vmem_to_hbm [thread:$0]  %s763_s0, 256, %s1598_s11, [#allocation4], %s1295_s9, %s1295_s9, %s1296_s29  }
 0x356   :  { %1278 = dma.done.wait [#allocation4], 256  }
 0x357   :  { %1279 = vsyncadd [#allocation4], 4294967040 }
 0x358   :  { %1280 = dma.done.wait [#allocation16], 128  }
 0x359   :  { %1281 = vsyncadd [#allocation16], 4294967168 }
 0x35a   :  { %787 = vsyncpa [#allocation3], 1 }
 0x35b   :  { %788 = vsyncpa [#allocation6], 1 }
 0x35c   :  { %789 = vsyncpa [#allocation9], 1 }
 0x35d   :  { %790 = vsyncpa [#allocation12], 1 }
 0x35e   :  { %791 = vsyncpa [#allocation4], 1 }
 0x35f   :  { %792 = vsyncpa [#allocation16], 1 }

// kernel: tpu_custom_call.1
= control target key start
LH: loop header
LB: loop body
LE: loop exit
PB: predicated region body
PF: predicated region fallthrough
CT: control target
= control target key end

     0   :  { %18 = vsyncpa [#allocation3], 0  ;;  %s1587_s0 = inlined_call_operand.hbm [shape: bf16[16,128], index: 0, kind: input, shape index: {}]   ;;  %s1588_s1 = inlined_call_operand.hbm [shape: bf16[16,128], index: 1, kind: input, shape index: {}]   ;;  %s1589_s2 = inlined_call_operand.hbm [shape: bf16[128,128], index: 2, kind: input, shape index: {}]   ;;  %s1590_s3 = inlined_call_operand.vmem [shape: f32[1,128], index: 3, kind: input, shape index: {}]   ;;  %s1591_s4 = inlined_call_operand.hbm [shape: bf16[128,128], index: 4, kind: input, shape index: {}]   ;;  %s1592_s5 = inlined_call_operand.vmem [shape: f32[1,128], index: 5, kind: input, shape index: {}]   ;;  %s1593_s6 = inlined_call_operand.hbm [shape: bf16[128,128], index: 6, kind: input, shape index: {}]   ;;  %s1594_s7 = inlined_call_operand.hbm [shape: bf16[128,128], index: 7, kind: input, shape index: {}]   ;;  %s1595_s8 = inlined_call_operand.vmem [shape: f32[1,128], index: 8, kind: input, shape index: {}]   ;;  %s1596_s9 = inlined_call_operand.hbm [shape: bf16[128,128], index: 9, kind: input, shape index: {}]   ;;  %s1597_s10 = inlined_call_operand.vmem [shape: f32[1,128], index: 10, kind: input, shape index: {}]   ;;  %s1598_s11 = inlined_call_operand.hbm [shape: f32[16,128], index: 11, kind: output, shape index: {0}]   ;;  %s1599_s12 = inlined_call_operand.hbm [shape: bf16[16,128], index: 12, kind: output, shape index: {1}]  }
   0x1   :  { %19 = vsyncpa [#allocation6], 0 }
   0x2   :  { %20 = vsyncpa [#allocation9], 0 }
   0x3   :  { %21 = vsyncpa [#allocation12], 0 }
   0x4   :  { %22 = vsyncpa [#allocation4], 0 }
   0x5   :  { %23 = vsyncpa [#allocation16], 0  ;;  %s1282_s21 = smov [#allocation5]   ;;  %s1283_s23 = smov [#allocation8]  }
   0x6   :  { %s41_s22 = sshll.u32 %s1282_s21, 4  ;;  %s67_s24 = sshll.u32 %s1283_s23, 4  ;;  %s42_s22 = int_to_ptr.vmem [resolvable:$true] %s41_s22  ;;  %s1362_s24 = int_to_ptr.vmem [resolvable:$true] %s67_s24 }
   0x7   :  { %s1072_s27 = scalar_lea.hbm %s1588_s1, 128 }
   0x8   :  { %p1073_p0 = scmp.ne.s32.totalorder %s1588_s1, %s1072_s27  ;;  %p1076_p1 = scmp.lt.u32.totalorder %s1072_s27, %s1588_s1 }
   0xa   :  { %p1078_p2 = pnand %p1076_p1, %p1073_p0 }
   0xc   :  { %1081 = shalt.err (!%p1078_p2)
}
   0xd   :  { %s1082_s14 = scalar_lea.vmem %s42_s22, 128  ;;  %p1087_p4 = scmp.lt.s32.totalorder %s42_s22, %s42_s22 }
   0xe   :  { %p1083_p3 = scmp.ne.s32.totalorder %s42_s22, %s1082_s14  ;;  %p1088_p5 = scmp.lt.s32.totalorder %s1082_s14, %s1082_s14 }
  0x10   :  { %p1089_p6 = por %p1088_p5, %p1087_p4 }
  0x12   :  { %p1090_p7 = pnand %p1089_p6, %p1083_p3 }
  0x14   :  { %1093 = shalt.err (!%p1090_p7)
}
  0x15   :  { %s1284_s15 = smov 64   ;;  %s1285_s16 = smov 4  }
  0x16   :  { %47 = dma.hbm_to_vmem [thread:$0]  %s1588_s1, 128, %s42_s22, [#allocation6], %s1284_s15, %s1284_s15, %s1285_s16  }
  0x17   :  { %s1094_s21 = scalar_lea.hbm %s1591_s4, 1024 }
  0x18   :  { %p1095_p8 = scmp.ne.s32.totalorder %s1591_s4, %s1094_s21  ;;  %p1098_p9 = scmp.lt.u32.totalorder %s1094_s21, %s1591_s4 }
  0x1a   :  { %p1100_p10 = pnand %p1098_p9, %p1095_p8 }
  0x1c   :  { %1103 = shalt.err (!%p1100_p10)
}
  0x1d   :  { %s1104_s28 = scalar_lea.vmem %s1362_s24, 1024  ;;  %p1109_p12 = scmp.lt.s32.totalorder %s1362_s24, %s1362_s24 }
  0x1e   :  { %p1105_p11 = scmp.ne.s32.totalorder %s1362_s24, %s1104_s28  ;;  %p1110_p13 = scmp.lt.s32.totalorder %s1104_s28, %s1104_s28 }
  0x20   :  { %p1111_p0 = por %p1110_p13, %p1109_p12 }
  0x22   :  { %p1112_p1 = pnand %p1111_p0, %p1105_p11 }
  0x24   :  { %1115 = shalt.err (!%p1112_p1)
}
  0x25   :  { %73 = dma.hbm_to_vmem [thread:$0]  %s1591_s4, 1024, %s1362_s24, [#allocation9], %s1284_s15, %s1284_s15, %s1285_s16  }
  0x26   :  { %s1286_s29 = smov [#allocation11]   ;;  %s1287_s13 = smov [#allocation2]  }
  0x27   :  { %s93_s30 = sshll.u32 %s1286_s29, 4  ;;  %s29_s14 = sshll.u32 %s1287_s13, 4  ;;  %s94_s30 = int_to_ptr.vmem [resolvable:$true] %s93_s30  ;;  %s1399_s14 = int_to_ptr.vmem [resolvable:$true] %s29_s14 }
  0x28   :  { %s1116_s19 = scalar_lea.hbm %s1594_s7, 1024 }
  0x29   :  { %p1117_p2 = scmp.ne.s32.totalorder %s1594_s7, %s1116_s19  ;;  %p1120_p3 = scmp.lt.u32.totalorder %s1116_s19, %s1594_s7 }
  0x2b   :  { %p1122_p4 = pnand %p1120_p3, %p1117_p2 }
  0x2d   :  { %1125 = shalt.err (!%p1122_p4)
}
  0x2e   :  { %s1126_s4 = scalar_lea.vmem %s94_s30, 1024  ;;  %p1131_p6 = scmp.lt.s32.totalorder %s94_s30, %s94_s30 }
  0x2f   :  { %p1127_p5 = scmp.ne.s32.totalorder %s94_s30, %s1126_s4  ;;  %p1132_p7 = scmp.lt.s32.totalorder %s1126_s4, %s1126_s4 }
  0x31   :  { %p1133_p8 = por %p1132_p7, %p1131_p6 }
  0x33   :  { %p1134_p9 = pnand %p1133_p8, %p1127_p5 }
  0x35   :  { %1137 = shalt.err (!%p1134_p9)
}
  0x36   :  { %99 = dma.hbm_to_vmem [thread:$0]  %s1594_s7, 1024, %s94_s30, [#allocation12], %s1284_s15, %s1284_s15, %s1285_s16  }
  0x37   :  { %s1138_s1 = scalar_lea.hbm %s1587_s0, 128 }
  0x38   :  { %p1139_p10 = scmp.ne.s32.totalorder %s1587_s0, %s1138_s1  ;;  %p1142_p11 = scmp.lt.u32.totalorder %s1138_s1, %s1587_s0 }
  0x3a   :  { %p1144_p12 = pnand %p1142_p11, %p1139_p10 }
  0x3c   :  { %1147 = shalt.err (!%p1144_p12)
}
  0x3d   :  { %s1148_s18 = scalar_lea.vmem %s1399_s14, 128  ;;  %p1153_p0 = scmp.lt.s32.totalorder %s1399_s14, %s1399_s14 }
  0x3e   :  { %p1149_p13 = scmp.ne.s32.totalorder %s1399_s14, %s1148_s18  ;;  %p1154_p1 = scmp.lt.s32.totalorder %s1148_s18, %s1148_s18 }
  0x40   :  { %p1155_p2 = por %p1154_p1, %p1153_p0 }
  0x42   :  { %p1156_p3 = pnand %p1155_p2, %p1149_p13 }
  0x44   :  { %1159 = shalt.err (!%p1156_p3)
}
  0x45   :  { %35 = dma.hbm_to_vmem [thread:$0]  %s1587_s0, 128, %s1399_s14, [#allocation3], %s1284_s15, %s1284_s15, %s1285_s16  }
  0x46   :  { %s1288_s19 = smov [#allocation7]   ;;  %s1289_s21 = smov [#allocation10]  }
  0x47   :  { %s53_s20 = sshll.u32 %s1288_s19, 4  ;;  %s81_s23 = sshll.u32 %s1289_s21, 4  ;;  %s54_s20 = int_to_ptr.vmem [resolvable:$true] %s53_s20  ;;  %s1436_s23 = int_to_ptr.vmem [resolvable:$true] %s81_s23 }
  0x48   :  { %s1160_s24 = scalar_lea.hbm %s1589_s2, 1024 }
  0x49   :  { %p1161_p4 = scmp.ne.s32.totalorder %s1589_s2, %s1160_s24  ;;  %p1164_p5 = scmp.lt.u32.totalorder %s1160_s24, %s1589_s2 }
  0x4b   :  { %p1166_p6 = pnand %p1164_p5, %p1161_p4 }
  0x4d   :  { %1169 = shalt.err (!%p1166_p6)
}
  0x4e   :  { %s1170_s0 = scalar_lea.vmem %s54_s20, 1024  ;;  %p1175_p8 = scmp.lt.s32.totalorder %s54_s20, %s54_s20 }
  0x4f   :  { %p1171_p7 = scmp.ne.s32.totalorder %s54_s20, %s1170_s0  ;;  %p1176_p9 = scmp.lt.s32.totalorder %s1170_s0, %s1170_s0 }
  0x51   :  { %p1177_p10 = por %p1176_p9, %p1175_p8 }
  0x53   :  { %p1178_p11 = pnand %p1177_p10, %p1171_p7 }
  0x55   :  { %1181 = shalt.err (!%p1178_p11)
}
  0x56   :  { %59 = dma.hbm_to_vmem [thread:$0]  %s1589_s2, 1024, %s54_s20, [#allocation6], %s1284_s15, %s1284_s15, %s1285_s16  }
  0x57   :  { %s1182_s17 = scalar_lea.hbm %s1593_s6, 1024 }
  0x58   :  { %p1183_p12 = scmp.ne.s32.totalorder %s1593_s6, %s1182_s17  ;;  %p1186_p13 = scmp.lt.u32.totalorder %s1182_s17, %s1593_s6 }
  0x5a   :  { %p1188_p0 = pnand %p1186_p13, %p1183_p12 }
  0x5c   :  { %1191 = shalt.err (!%p1188_p0)
}
  0x5d   :  { %s1192_s21 = scalar_lea.vmem %s1436_s23, 1024  ;;  %p1197_p2 = scmp.lt.s32.totalorder %s1436_s23, %s1436_s23 }
  0x5e   :  { %p1193_p1 = scmp.ne.s32.totalorder %s1436_s23, %s1192_s21  ;;  %p1198_p3 = scmp.lt.s32.totalorder %s1192_s21, %s1192_s21 }
  0x60   :  { %p1199_p4 = por %p1198_p3, %p1197_p2 }
  0x62   :  { %p1200_p5 = pnand %p1199_p4, %p1193_p1 }
  0x64   :  { %1203 = shalt.err (!%p1200_p5)
}
  0x65   :  { %87 = dma.hbm_to_vmem [thread:$0]  %s1593_s6, 1024, %s1436_s23, [#allocation9], %s1284_s15, %s1284_s15, %s1285_s16  }
  0x66   :  { %s1290_s25 = smov [#allocation13]   ;;  %s1204_s27 = scalar_lea.hbm %s1596_s9, 1024 }
  0x67   :  { %s107_s4 = sshll.u32 %s1290_s25, 4  ;;  %p1205_p6 = scmp.ne.s32.totalorder %s1596_s9, %s1204_s27  ;;  %s108_s4 = int_to_ptr.vmem [resolvable:$true] %s107_s4 }
  0x68   :  { %p1208_p7 = scmp.lt.u32.totalorder %s1204_s27, %s1596_s9 }
  0x6a   :  { %p1210_p8 = pnand %p1208_p7, %p1205_p6 }
  0x6c   :  { %1213 = shalt.err (!%p1210_p8)
}
  0x6d   :  { %s1214_s22 = scalar_lea.vmem %s108_s4, 1024  ;;  %p1219_p10 = scmp.lt.s32.totalorder %s108_s4, %s108_s4 }
  0x6e   :  { %p1215_p9 = scmp.ne.s32.totalorder %s108_s4, %s1214_s22  ;;  %p1220_p11 = scmp.lt.s32.totalorder %s1214_s22, %s1214_s22 }
  0x70   :  { %p1221_p12 = por %p1220_p11, %p1219_p10 }
  0x72   :  { %p1222_p13 = pnand %p1221_p12, %p1215_p9 }
  0x74   :  { %1225 = shalt.err (!%p1222_p13)
}
  0x75   :  { %113 = dma.hbm_to_vmem [thread:$0]  %s1596_s9, 1024, %s108_s4, [#allocation12], %s1284_s15, %s1284_s15, %s1285_s16  }
  0x76   :  { %1270 = dma.done.wait [#allocation3], 128  }
  0x77   :  { %1271 = vsyncadd [#allocation3], 4294967168 }
  0x78   :  { %1272 = dma.done.wait [#allocation6], 1152  }
  0x79   :  { %1273 = vsyncadd [#allocation6], 4294966144 }
  0x7a   :  { %1274 = dma.done.wait [#allocation9], 2048  }
  0x7b   :  { %1275 = vsyncadd [#allocation9], 4294965248 }
  0x7c   :  { %1276 = dma.done.wait [#allocation12], 2048  }
  0x7d   :  { %1277 = vsyncadd [#allocation12], 4294965248  ;;  %v1291_v0 = vmov 0.0   ;;  %vm1292_vm0 = vmmov 0   ;;  %v1012_v1 = vld [vmem:[#allocation7] sm:$0xff]   ;;  %v1014_v3 = vld [vmem:[#allocation7 + $0x8] sm:$0xff]  }
  0x7e   :  { %897 = vmatprep.subr.bf16.mxu0 %v1291_v0  ;;  %917 = vmatprep.subr.bf16.mxu1 %v1291_v0  ;;  %v1013_v2 = vld [vmem:[#allocation8] sm:$0xff]   ;;  %v1015_v4 = vld [vmem:[#allocation8 + $0x8] sm:$0xff]   ;;  %v1016_v5 = vld [vmem:[#allocation7 + $0x10] sm:$0xff]   ;;  %s1293_s18 = smov [#allocation15]  }
  0x7f   :  { %913 = vmatprep.mubr.msk.bf16.mxu0 %vm1292_vm0, %v1291_v0  ;;  %933 = vmatprep.mubr.msk.bf16.mxu1 %vm1292_vm0, %v1291_v0  ;;  %v1017_v6 = vld [vmem:[#allocation8 + $0x10] sm:$0xff]   ;;  %v1018_v7 = vld [vmem:[#allocation7 + $0x18] sm:$0xff]   ;;  %v1020_v9 = vld [vmem:[#allocation7 + $0x20] sm:$0xff]   ;;  %s774_s7 = sshll.u32 %s1293_s18, 4  ;;  %s775_s7 = int_to_ptr.vmem [resolvable:$true] %s774_s7 }
  0x80   :  { %898 = vmatpush3.bf16.msra.mxu0 %v1012_v1  ;;  %918 = vmatpush3.bf16.msra.mxu1 %v1013_v2  ;;  %v1019_v8 = vld [vmem:[#allocation8 + $0x18] sm:$0xff]   ;;  %v1021_v10 = vld [vmem:[#allocation8 + $0x20] sm:$0xff]   ;;  %v1022_v11 = vld [vmem:[#allocation7 + $0x28] sm:$0xff]   ;;  %s1226_s30 = scalar_lea.vmem %s775_s7, 128  ;;  %p1231_p1 = scmp.lt.s32.totalorder %s775_s7, %s775_s7 }
  0x81   :  { %899 = vmatprep.subr.bf16.mxu0 %v1291_v0  ;;  %919 = vmatprep.subr.bf16.mxu1 %v1291_v0  ;;  %v1023_v12 = vld [vmem:[#allocation8 + $0x28] sm:$0xff]   ;;  %v1024_v13 = vld [vmem:[#allocation7 + $0x30] sm:$0xff]   ;;  %v1026_v15 = vld [vmem:[#allocation7 + $0x38] sm:$0xff]   ;;  %p1227_p0 = scmp.ne.s32.totalorder %s775_s7, %s1226_s30  ;;  %p1232_p2 = scmp.lt.s32.totalorder %s1226_s30, %s1226_s30 }
  0x82   :  { %v1025_v14 = vld [vmem:[#allocation8 + $0x30] sm:$0xff]   ;;  %v1027_v17 = vld [vmem:[#allocation8 + $0x38] sm:$0xff]   ;;  %v1030_v19 = vld [vmem:[#allocation11] sm:$0xff]  }
  0x83   :  { %v1506_v16 = vld [vmem:[#allocation2] sm:$0xff]   ;;  %v1508_v18 = vld [vmem:[#allocation5] sm:$0xff]   ;;  %v1031_v20 = vld [vmem:[#allocation10] sm:$0xff]   ;;  %p1233_p3 = por %p1232_p2, %p1231_p1 }
  0x84   :  { %900 = vmatpush3.bf16.msra.mxu0 %v1014_v3  ;;  %920 = vmatpush3.bf16.msra.mxu1 %v1015_v4  ;;  %v1032_v21 = vld [vmem:[#allocation11 + $0x8] sm:$0xff]   ;;  %v1034_v23 = vld [vmem:[#allocation11 + $0x10] sm:$0xff]   ;;  %v1036_v25 = vld [vmem:[#allocation11 + $0x18] sm:$0xff]   ;;  %v402_v61 = vunpack.c.l.bf16 %v1506_v16  ;;  %v407_v62 = vunpack.c.l.bf16 %v1508_v18  ;;  %v403_v63 = vunpack.c.h.bf16 %v1506_v16  ;;  %v408_v2 = vunpack.c.h.bf16 %v1508_v18 }
  0x85   :  { %901 = vmatprep.subr.bf16.mxu0 %v1291_v0  ;;  %921 = vmatprep.subr.bf16.mxu1 %v1291_v0  ;;  %v1033_v22 = vld [vmem:[#allocation10 + $0x8] sm:$0xff]   ;;  %v1035_v24 = vld [vmem:[#allocation10 + $0x10] sm:$0xff]   ;;  %v1037_v26 = vld [vmem:[#allocation10 + $0x18] sm:$0xff]   ;;  %p1234_p4 = pnand %p1233_p3, %p1227_p0 }
  0x86   :  { %v1038_v27 = vld [vmem:[#allocation11 + $0x20] sm:$0xff]   ;;  %v1040_v29 = vld [vmem:[#allocation11 + $0x28] sm:$0xff]   ;;  %v1042_v31 = vld [vmem:[#allocation11 + $0x30] sm:$0xff]  }
  0x87   :  { %v1039_v28 = vld [vmem:[#allocation10 + $0x20] sm:$0xff]   ;;  %v1041_v30 = vld [vmem:[#allocation10 + $0x28] sm:$0xff]   ;;  %v1043_v32 = vld [vmem:[#allocation10 + $0x30] sm:$0xff]  }
  0x88   :  { %902 = vmatpush3.bf16.msra.mxu0 %v1016_v5  ;;  %922 = vmatpush3.bf16.msra.mxu1 %v1017_v6  ;;  %v1044_v33 = vld [vmem:[#allocation11 + $0x38] sm:$0xff]   ;;  %v793_v35 = vld [vmem:[%s1590_s3] ss:$0 sm:$0xff] }
  0x89   :  { %903 = vmatprep.subr.bf16.mxu0 %v1291_v0  ;;  %923 = vmatprep.subr.bf16.mxu1 %v1291_v0  ;;  %v1045_v34 = vld [vmem:[#allocation10 + $0x38] sm:$0xff]   ;;  %v805_v36 = vld [vmem:[%s1592_s5] ss:$0 sm:$0xff] }
  0x8c   :  { %904 = vmatpush3.bf16.msra.mxu0 %v1018_v7  ;;  %924 = vmatpush3.bf16.msra.mxu1 %v1019_v8 }
  0x8d   :  { %905 = vmatprep.subr.bf16.mxu0 %v1291_v0  ;;  %925 = vmatprep.subr.bf16.mxu1 %v1291_v0 }
  0x90   :  { %906 = vmatpush3.bf16.msra.mxu0 %v1020_v9  ;;  %926 = vmatpush3.bf16.msra.mxu1 %v1021_v10 }
  0x91   :  { %907 = vmatprep.subr.bf16.mxu0 %v1291_v0  ;;  %927 = vmatprep.subr.bf16.mxu1 %v1291_v0 }
  0x94   :  { %908 = vmatpush3.bf16.msra.mxu0 %v1022_v11  ;;  %928 = vmatpush3.bf16.msra.mxu1 %v1023_v12  ;;  %v1046_v11 = vld [vmem:[#allocation13] sm:$0xff]  }
  0x95   :  { %909 = vmatprep.subr.bf16.mxu0 %v1291_v0  ;;  %929 = vmatprep.subr.bf16.mxu1 %v1291_v0 }
  0x98   :  { %910 = vmatpush3.bf16.msra.mxu0 %v1024_v13  ;;  %930 = vmatpush3.bf16.msra.mxu1 %v1025_v14  ;;  %v1047_v13 = vld [vmem:[#allocation13 + $0x8] sm:$0xff]   ;;  %v1048_v14 = vld [vmem:[#allocation13 + $0x10] sm:$0xff]  }
  0x99   :  { %911 = vmatprep.subr.bf16.mxu0 %v1291_v0  ;;  %931 = vmatprep.subr.bf16.mxu1 %v1291_v0 }
  0x9c   :  { %912 = vmatpush3.bf16.msra.mxu0 %v1026_v15  ;;  %932 = vmatpush3.bf16.msra.mxu1 %v1027_v17  ;;  %v1049_v15 = vld [vmem:[#allocation13 + $0x18] sm:$0xff]   ;;  %v1051_v17 = vld [vmem:[#allocation13 + $0x28] sm:$0xff]  }
  0x9d   :  { %937 = vmatprep.subr.bf16.mxu0 %v1291_v0  ;;  %957 = vmatprep.subr.bf16.mxu1 %v1291_v0 }
  0x9f   :  { %914 = vmatmul.mubr.bf16.vlgmr.msra.gmra.mrb[0].mxu0 %v1506_v16  ;;  %934 = vmatmul.mubr.bf16.vlgmr.msra.gmra.mrb[0].mxu1 %v1508_v18  ;;  %v1050_v16 = vld [vmem:[#allocation13 + $0x20] sm:$0xff]   ;;  %v1052_v18 = vld [vmem:[#allocation13 + $0x30] sm:$0xff]  }
  0xa0   :  { %953 = vmatprep.mubr.msk.bf16.mxu0 %vm1292_vm0, %v1291_v0  ;;  %973 = vmatprep.mubr.msk.bf16.mxu1 %vm1292_vm0, %v1291_v0 }
  0xa1   :  { %938 = vmatpush3.bf16.msra.mxu0 %v1030_v19  ;;  %958 = vmatpush3.bf16.msra.mxu1 %v1031_v20  ;;  %v1053_v19 = vld [vmem:[#allocation13 + $0x38] sm:$0xff]  }
  0xa2   :  { %939 = vmatprep.subr.bf16.mxu0 %v1291_v0  ;;  %959 = vmatprep.subr.bf16.mxu1 %v1291_v0 }
  0xa5   :  { %940 = vmatpush3.bf16.msra.mxu0 %v1032_v21  ;;  %960 = vmatpush3.bf16.msra.mxu1 %v1033_v22  ;;  %v833_v22 = vld [vmem:[%s1595_s8] ss:$0 sm:$0xff] }
  0xa6   :  { %941 = vmatprep.subr.bf16.mxu0 %v1291_v0  ;;  %961 = vmatprep.subr.bf16.mxu1 %v1291_v0 }
  0xa9   :  { %942 = vmatpush3.bf16.msra.mxu0 %v1034_v23  ;;  %962 = vmatpush3.bf16.msra.mxu1 %v1035_v24 }
  0xaa   :  { %943 = vmatprep.subr.bf16.mxu0 %v1291_v0  ;;  %963 = vmatprep.subr.bf16.mxu1 %v1291_v0 }
  0xad   :  { %944 = vmatpush3.bf16.msra.mxu0 %v1036_v25  ;;  %964 = vmatpush3.bf16.msra.mxu1 %v1037_v26 }
  0xae   :  { %945 = vmatprep.subr.bf16.mxu0 %v1291_v0  ;;  %965 = vmatprep.subr.bf16.mxu1 %v1291_v0 }
  0xb1   :  { %946 = vmatpush3.bf16.msra.mxu0 %v1038_v27  ;;  %966 = vmatpush3.bf16.msra.mxu1 %v1039_v28 }
  0xb2   :  { %947 = vmatprep.subr.bf16.mxu0 %v1291_v0  ;;  %967 = vmatprep.subr.bf16.mxu1 %v1291_v0 }
  0xb5   :  { %948 = vmatpush3.bf16.msra.mxu0 %v1040_v29  ;;  %968 = vmatpush3.bf16.msra.mxu1 %v1041_v30 }
  0xb6   :  { %949 = vmatprep.subr.bf16.mxu0 %v1291_v0  ;;  %969 = vmatprep.subr.bf16.mxu1 %v1291_v0 }
  0xb9   :  { %950 = vmatpush3.bf16.msra.mxu0 %v1042_v31  ;;  %970 = vmatpush3.bf16.msra.mxu1 %v1043_v32 }
  0xba   :  { %951 = vmatprep.subr.bf16.mxu0 %v1291_v0  ;;  %971 = vmatprep.subr.bf16.mxu1 %v1291_v0 }
  0xbd   :  { %952 = vmatpush3.bf16.msra.mxu0 %v1044_v33  ;;  %972 = vmatpush3.bf16.msra.mxu1 %v1045_v34 }
  0xbe   :  { %977 = vmatprep.subr.bf16.mxu0 %v1291_v0 }
 0x172   :  { %v253_v37 = vpop.f32.mrb[0].mxu0  ;;  %v383_v39 = vpop.f32.mrb[0].mxu1 }
 0x173   :  { %v254_v38 = vadd.f32 %v793_v35, %v253_v37  ;;  %v915_v40 = vpop.f32.mrb[1].mxu0  ;;  %v384_v41 = vadd.f32 %v805_v36, %v383_v39  ;;  %v935_v42 = vpop.f32.mrb[1].mxu1 }
 0x174   :  { %v256_v43 = vpop.f32.mrb[2].mxu0  ;;  %v386_v46 = vpop.f32.mrb[2].mxu1 }
 0x175   :  { %v803_v44 = vmul.f32 -1.442695, %v254_v38  ;;  %v257_v45 = vadd.f32 %v793_v35, %v256_v43  ;;  %v916_v47 = vpop.f32.mrb[3].mxu0  ;;  %v815_v48 = vmul.f32 -1.442695, %v384_v41  ;;  %v387_v49 = vadd.f32 %v805_v36, %v386_v46  ;;  %v936_v50 = vpop.f32.mrb[3].mxu1 }
 0x177   :  { %1056 = vpow2.f32 %v803_v44  ;;  %v804_v51 = vmul.f32 -1.442695, %v257_v45  ;;  %v816_v52 = vmul.f32 -1.442695, %v387_v49 }
 0x178   :  { %1058 = vpow2.f32 %v815_v48 }
 0x179   :  { %1060 = vpow2.f32 %v804_v51 }
 0x17a   :  { %1062 = vpow2.f32 %v816_v52 }
 0x181   :  { %v1057_v53 = vpop.eup %1056 }
 0x182   :  { %v1059_v54 = vpop.eup %1058  ;;  %v266_v55 = vadd.f32 1.0, %v1057_v53 }
 0x183   :  { %v1061_v56 = vpop.eup %1060  ;;  %v396_v57 = vadd.f32 1.0, %v1059_v54 }
 0x184   :  { %v1063_v58 = vpop.eup %1062  ;;  %1064 = vrcp.f32 %v266_v55  ;;  %v267_v59 = vadd.f32 1.0, %v1061_v56 }
 0x185   :  { %1066 = vrcp.f32 %v396_v57  ;;  %v397_v60 = vadd.f32 1.0, %v1063_v58 }
 0x186   :  { %1068 = vrcp.f32 %v267_v59 }
 0x187   :  { %1070 = vrcp.f32 %v397_v60 }
 0x18e   :  { %v1065_v1 = vpop.eup %1064 }
 0x18f   :  { %v1067_v3 = vpop.eup %1066  ;;  %v404_v4 = vmul.f32 %v1065_v1, %v402_v61 }
 0x190   :  { %v1069_v5 = vpop.eup %1068  ;;  %v409_v6 = vmul.f32 %v1067_v3, %v407_v62 }
 0x191   :  { %v1071_v7 = vpop.eup %1070  ;;  %v405_v8 = vmul.f32 %v1069_v5, %v403_v63 }
 0x192   :  { %v410_v9 = vmul.f32 %v1071_v7, %v408_v2 }
 0x193   :  { %v406_v10 = vpack.c.bf16 %v405_v8, %v404_v4 }
 0x194   :  { %v411_v12 = vpack.c.bf16 %v410_v9, %v409_v6 }
 0x195   :  { %974 = vmatmul.mubr.bf16.vlgmr.msra.gmra.mrb[4].mxu1 %v406_v10 }
 0x196   :  { %954 = vmatmul.mubr.bf16.vlgmr.msra.gmra.mrb[4].mxu0 %v411_v12 }
 0x197   :  { %978 = vmatpush3.bf16.msra.mxu0 %v1046_v11  ;;  %993 = vmatprep.mubr.msk.bf16.mxu0 %vm1292_vm0, %v1291_v0 }
 0x198   :  { %979 = vmatprep.subr.bf16.mxu0 %v1291_v0 }
 0x19b   :  { %980 = vmatpush3.bf16.msra.mxu0 %v1047_v13 }
 0x19c   :  { %981 = vmatprep.subr.bf16.mxu0 %v1291_v0 }
 0x19f   :  { %982 = vmatpush3.bf16.msra.mxu0 %v1048_v14 }
 0x1a0   :  { %983 = vmatprep.subr.bf16.mxu0 %v1291_v0 }
 0x1a3   :  { %984 = vmatpush3.bf16.msra.mxu0 %v1049_v15 }
 0x1a4   :  { %985 = vmatprep.subr.bf16.mxu0 %v1291_v0 }
 0x1a7   :  { %986 = vmatpush3.bf16.msra.mxu0 %v1050_v16 }
 0x1a8   :  { %987 = vmatprep.subr.bf16.mxu0 %v1291_v0 }
 0x1ab   :  { %988 = vmatpush3.bf16.msra.mxu0 %v1051_v17 }
 0x1ac   :  { %989 = vmatprep.subr.bf16.mxu0 %v1291_v0 }
 0x1af   :  { %990 = vmatpush3.bf16.msra.mxu0 %v1052_v18 }
 0x1b0   :  { %991 = vmatprep.subr.bf16.mxu0 %v1291_v0 }
 0x1b3   :  { %992 = vmatpush3.bf16.msra.mxu0 %v1053_v19 }
 0x268   :  { %v615_v20 = vpop.f32.mrb[4].mxu1 }
 0x269   :  { %v526_v21 = vpop.f32.mrb[4].mxu0  ;;  %v975_v23 = vpop.f32.mrb[5].mxu1 }
 0x26a   :  { %v616_v24 = vadd.f32 %v615_v20, %v526_v21  ;;  %v955_v25 = vpop.f32.mrb[5].mxu0  ;;  %v618_v26 = vpop.f32.mrb[6].mxu1 }
 0x26b   :  { %v529_v27 = vpop.f32.mrb[6].mxu0  ;;  %v976_v28 = vpop.f32.mrb[7].mxu1 }
 0x26c   :  { %v629_v29 = vadd.f32 %v833_v22, %v616_v24  ;;  %v619_v30 = vadd.f32 %v618_v26, %v529_v27  ;;  %v956_v31 = vpop.f32.mrb[7].mxu0 }
 0x26e   :  { %v630_v32 = vadd.f32 %v833_v22, %v619_v30  ;;  %v631_v33 = vmax.f32 %v629_v29, 0.0 }
 0x270   :  { %v632_v0 = vmax.f32 %v630_v32, 0.0 }
 0x272   :  { %v633_v34 = vpack.c.bf16 %v632_v0, %v631_v33 }
 0x274   :  { %851 = vst [vmem:[#allocation15] sm:$0xff] %v633_v34   ;;  %994 = vmatmul.mubr.bf16.vlgmr.msra.gmra.mrb[8].mxu0 %v633_v34 }
 0x275   :  { %1237 = shalt.err (!%p1234_p4)
}
 0x276   :  { %s1238_s21 = scalar_lea.hbm %s1599_s12, 128 }
 0x277   :  { %p1239_p5 = scmp.ne.s32.totalorder %s1599_s12, %s1238_s21  ;;  %p1242_p6 = scmp.lt.u32.totalorder %s1238_s21, %s1599_s12 }
 0x279   :  { %p1244_p7 = pnand %p1242_p6, %p1239_p5 }
 0x27b   :  { %1247 = shalt.err (!%p1244_p7)
}
 0x27c   :  { %780 = dma.vmem_to_hbm [thread:$0]  %s775_s7, 128, %s1599_s12, [#allocation16], %s1284_s15, %s1284_s15, %s1285_s16  }
 0x27d   :  { %v836_v35 = vld [vmem:[%s1597_s10] ss:$0 sm:$0xff]  ;;  %s1294_s1 = smov [#allocation14]  }
 0x27e   :  { %s762_s0 = sshll.u32 %s1294_s1, 4  ;;  %s763_s0 = int_to_ptr.vmem [resolvable:$true] %s762_s0 }
 0x27f   :  { %s1248_s14 = scalar_lea.vmem %s763_s0, 256  ;;  %p1253_p9 = scmp.lt.s32.totalorder %s763_s0, %s763_s0 }
 0x280   :  { %p1249_p8 = scmp.ne.s32.totalorder %s763_s0, %s1248_s14  ;;  %p1254_p10 = scmp.lt.s32.totalorder %s1248_s14, %s1248_s14 }
 0x282   :  { %p1255_p11 = por %p1254_p10, %p1253_p9 }
 0x284   :  { %p1256_p12 = pnand %p1255_p11, %p1249_p8 }
 0x347   :  { %v748_v36 = vpop.f32.mrb[8].mxu0 }
 0x348   :  { %v749_v37 = vadd.f32 %v836_v35, %v748_v36  ;;  %v995_v38 = vpop.f32.mrb[9].mxu0 }
 0x349   :  { %v751_v39 = vpop.f32.mrb[10].mxu0 }
 0x34a   :  { %755 = vst [vmem:[#allocation14] sm:$0xff] %v749_v37  ;;  %v752_v40 = vadd.f32 %v836_v35, %v751_v39  ;;  %v996_v41 = vpop.f32.mrb[11].mxu0 }
 0x34c   :  { %756 = vst [vmem:[#allocation14 + $0x8] sm:$0xff] %v752_v40 }
 0x34d   :  { %1259 = shalt.err (!%p1256_p12)
}
 0x34e   :  { %s1260_s15 = scalar_lea.hbm %s1598_s11, 256 }
 0x34f   :  { %p1261_p13 = scmp.ne.s32.totalorder %s1598_s11, %s1260_s15  ;;  %p1264_p0 = scmp.lt.u32.totalorder %s1260_s15, %s1598_s11 }
 0x351   :  { %p1266_p1 = pnand %p1264_p0, %p1261_p13 }
 0x353   :  { %1269 = shalt.err (!%p1266_p1)
}
 0x354   :  { %s1295_s9 = smov 128   ;;  %s1296_s29 = smov 8  }
 0x355   :  { %768 = dma.vmem_to_hbm [thread:$0]  %s763_s0, 256, %s1598_s11, [#allocation4], %s1295_s9, %s1295_s9, %s1296_s29  }
 0x356   :  { %1278 = dma.done.wait [#allocation4], 256  }
 0x357   :  { %1279 = vsyncadd [#allocation4], 4294967040 }
 0x358   :  { %1280 = dma.done.wait [#allocation16], 128  }
 0x359   :  { %1281 = vsyncadd [#allocation16], 4294967168 }
 0x35a   :  { %787 = vsyncpa [#allocation3], 1 }
 0x35b   :  { %788 = vsyncpa [#allocation6], 1 }
 0x35c   :  { %789 = vsyncpa [#allocation9], 1 }
 0x35d   :  { %790 = vsyncpa [#allocation12], 1 }
 0x35e   :  { %791 = vsyncpa [#allocation4], 1 }
 0x35f   :  { %792 = vsyncpa [#allocation16], 1 }

</bundles_post_ra>
